<compile_context>
chip_gen: v7x
topology: tpu7x:2x2x1
jax: 0.10.0
libtpu: 0.0.40
codegen_flags: <defaults>
</compile_context>

<pallas_src>
import functools
import math

import jax
import jax.numpy as jnp
from jax.experimental import pallas as pl
from jax.experimental.pallas import tpu as pltpu


def _attention_kernel(x_ref, wqkv_ref, bqkv_ref, wout_ref, bout_ref, o_ref,
                      ctx_ref, *, heads, seq_len, mm_dtype, approx_recip):
    # Block is (rows, d) with rows = bb * seq_len (bb batch elements resident).
    rows, d = x_ref.shape
    n = seq_len
    bb = rows // n
    hd = d // heads

    x = x_ref[...].astype(mm_dtype)                       # (rows, d)
    wqkv = wqkv_ref[...].astype(mm_dtype)                 # (d, 3d)
    wout = wout_ref[...].astype(mm_dtype)                 # (d, d)
    bqkv = bqkv_ref[...].astype(jnp.float32)              # (1, 3d)  2-D read
    bout = bout_ref[...].astype(jnp.float32)              # (1, d)   2-D read

    # Fused QKV projection over every resident row: one MXU matmul.
    # (Softmax scale already folded into the q columns of W_qkv / b_qkv.)
    qkv = jnp.dot(x, wqkv, preferred_element_type=jnp.float32) + bqkv

    # Leading-dim split only (layout-free): (rows, 3d) -> (bb, n, 3d).
    qkv3 = qkv.reshape(bb, n, 3 * d)
    q = qkv3[:, :, 0 * d:1 * d]
    k = qkv3[:, :, 1 * d:2 * d]
    v = qkv3[:, :, 2 * d:3 * d]

    # Per-head loop (static => compile-time lane offsets), batched over the
    # resident batch elements with a leading batch dim.  No K transpose, no
    # concatenates: each head's context is stored directly into VMEM scratch,
    # which also terminates its live range before the next head.
    for h in range(heads):
        c0 = h * hd
        qh = q[:, :, c0:c0 + hd]                          # (bb, n, hd)
        kh = k[:, :, c0:c0 + hd]                          # (bb, n, hd)
        vh = v[:, :, c0:c0 + hd]                          # (bb, n, hd)

        # scores[b,i,j] = sum_c q[b,i,c] * k[b,j,c] (contract hd, no vxpose).
        s = jnp.einsum('bqc,bkc->bqk', qh, kh,
                       preferred_element_type=jnp.float32)    # (bb, n, n)
        s = s - jnp.max(s, axis=-1, keepdims=True)
        e = jnp.exp(s)                                        # EUP
        denom = jnp.sum(e, axis=-1, keepdims=True)
        if approx_recip:
            attn = e * pl.reciprocal(denom, approx=True)      # EUP, not VPU div
        else:
            attn = e / denom

        ctx_ref[:, :, c0:c0 + hd] = jnp.einsum(
            'bqk,bkc->bqc', attn.astype(mm_dtype), vh.astype(mm_dtype),
            preferred_element_type=jnp.float32)

    # Fused output projection over all resident rows: one MXU matmul.
    ctx = ctx_ref[...].reshape(rows, d).astype(mm_dtype)
    out = jnp.dot(ctx, wout, preferred_element_type=jnp.float32) + bout
    o_ref[...] = out.astype(o_ref.dtype)


def _batch_grid(b, n):
    """Split across TensorCores only when the chip has >1 TC AND each core's
    row slab is large enough to amortize per-step overhead (~0.35us) and the
    duplicated weight copies."""
    if b <= 1 or b % 2 != 0:
        return 1
    if (b // 2) * n < 256:            # rows per core too small to amortize
        return 1
    try:
        kind = jax.devices()[0].device_kind.lower()
    except Exception:
        return 1
    multi_tc = ("v7" in kind) or ("v4" in kind)
    return 2 if multi_tc else 1


def prepare_params(wqkv, bqkv, wout, bout, *, heads):
    """One-time parameter preparation (call once, reuse across forward calls):
    transpose PyTorch (out, in) weights to (in, out) and fold the softmax
    scale into the q columns of W_qkv and the q slice of b_qkv."""
    d = wout.shape[0]
    scale = (d // heads) ** (-0.5)
    wqkv_t = wqkv.T                                           # (d, 3d)
    q_scale = jnp.concatenate([jnp.full((d,), scale, wqkv_t.dtype),
                               jnp.ones((2 * d,), wqkv_t.dtype)])
    wqkv_t = wqkv_t * q_scale[None, :]
    bqkv_s = (bqkv * q_scale)[None, :]                        # (1, 3d)
    return wqkv_t, bqkv_s, wout.T, bout[None, :]


def protein_self_attention(x, wqkv_t, bqkv, wout_t, bout, *, heads,
                           batch_grid=None, use_bf16_matmul=False,
                           approx_softmax_recip=True):
    b, n, d = x.shape
    assert d % heads == 0
    if batch_grid is None:
        batch_grid = _batch_grid(b, n)
    if b % batch_grid != 0:
        batch_grid = 1
    bb = b // batch_grid
    rows = bb * n

    # Present the kernel with a 2-D (batch*seq, dim) slab (free reshape in XLA)
    # so both projections batch over every resident row.
    x2 = x.reshape(b * n, d)

    mm_dtype = jnp.bfloat16 if use_bf16_matmul else jnp.float32
    kernel = functools.partial(_attention_kernel, heads=heads, seq_len=n,
                               mm_dtype=mm_dtype,
                               approx_recip=approx_softmax_recip)

    # Rough f32 working-set estimate; clamp to [32 MiB, 64 MiB] so v5e's
    # 16 MiB scoped default never gates us and we never exceed v7x physical.
    est = 4 * (4 * rows * d                       # double-buffered x / out
               + 2 * (3 * d * d + d * d + 4 * d)  # double-buffered weights+bias
               + rows * 3 * d                     # qkv intermediate
               + bb * n * d                       # ctx scratch
               + 4 * bb * n * n)                  # per-head score temporaries
    vmem_limit = int(min(64 * 2**20, max(32 * 2**20, 2 * est)))

    out2 = pl.pallas_call(
        kernel,
        out_shape=jax.ShapeDtypeStruct((b * n, d), x.dtype),
        grid_spec=pltpu.PrefetchScalarGridSpec(
            num_scalar_prefetch=0,
            grid=(batch_grid,),
            in_specs=[
                pl.BlockSpec((rows, d), lambda i: (i, 0)),      # x rows
                pl.BlockSpec((d, 3 * d), lambda i: (0, 0)),     # W_qkv (full)
                pl.BlockSpec((1, 3 * d), lambda i: (0, 0)),     # b_qkv
                pl.BlockSpec((d, d), lambda i: (0, 0)),         # W_out (full)
                pl.BlockSpec((1, d), lambda i: (0, 0)),         # b_out
            ],
            out_specs=pl.BlockSpec((rows, d), lambda i: (i, 0)),
            scratch_shapes=[pltpu.VMEM((bb, n, d), jnp.float32)],  # ctx
        ),
        compiler_params=pltpu.CompilerParams(
            dimension_semantics=("parallel",),
            vmem_limit_bytes=vmem_limit),
    )(x2, wqkv_t, bqkv, wout_t, bout)
    return out2.reshape(b, n, d)


def _reference(x, wqkv, bqkv, wout, bout, *, heads):
    # Pure-JAX reference mirroring the PyTorch forward (raw PyTorch-layout
    # parameters, explicit post-matmul scaling).
    b, n, d = x.shape
    hd = d // heads
    scale = hd ** (-0.5)
    qkv = x @ wqkv.T + bqkv                                    # (b, n, 3d)
    q, k, v = jnp.split(qkv, 3, axis=-1)

    def to_heads(t):
        return t.reshape(b, n, heads, hd).transpose(0, 2, 1, 3)

    q, k, v = map(to_heads, (q, k, v))
    dots = jnp.einsum('bhqc,bhkc->bhqk', q, k) * scale
    attn = jax.nn.softmax(dots, axis=-1)
    out = jnp.einsum('bhqk,bhkc->bhqc', attn, v)
    out = out.transpose(0, 2, 1, 3).reshape(b, n, d)
    return out @ wout.T + bout


if __name__ == "__main__":
    batch, seq, dim, heads = 2, 16, 64, 8

    key = jax.random.PRNGKey(0)
    kx, kwq, kbq, kwo, kbo = jax.random.split(key, 5)

    x = jax.random.normal(kx, (batch, seq, dim), dtype=jnp.float32)

    # Deterministic PyTorch-layout parameters (nn.Linear-style uniform bounds).
    bound = 1.0 / math.sqrt(dim)
    wqkv = jax.random.uniform(kwq, (3 * dim, dim), jnp.float32, -bound, bound)
    bqkv = jax.random.uniform(kbq, (3 * dim,), jnp.float32, -bound, bound)
    wout = jax.random.uniform(kwo, (dim, dim), jnp.float32, -bound, bound)
    bout = jax.random.uniform(kbo, (dim,), jnp.float32, -bound, bound)

    # One-time param prep: transpose + fold softmax scale into W_qkv / b_qkv.
    params = prepare_params(wqkv, bqkv, wout, bout, heads=heads)

    out = protein_self_attention(x, *params, heads=heads)
    out = jax.block_until_ready(out)

    ref = _reference(x, wqkv, bqkv, wout, bout, heads=heads)
    assert out.shape == (batch, seq, dim)
    # Tolerance leaves room for the approximate (EUP) softmax reciprocal.
    assert jnp.allclose(out, ref, atol=2e-3, rtol=2e-3), "mismatch vs reference"

    print("KERNEL_OK")
</pallas_src>

<mosaic_0001>
module attributes {stable_mosaic.version = 11 : i64} {
  func.func @_attention_kernel(%arg0: i32, %arg1: memref<32x64xf32, #tpu.memory_space<vmem>>, %arg2: memref<64x192xf32, #tpu.memory_space<vmem>>, %arg3: memref<1x192xf32, #tpu.memory_space<vmem>>, %arg4: memref<64x64xf32, #tpu.memory_space<vmem>>, %arg5: memref<1x64xf32, #tpu.memory_space<vmem>>, %arg6: memref<32x64xf32, #tpu.memory_space<vmem>>, %arg7: memref<2x16x64xf32, #tpu.memory_space<vmem>>) attributes {dimension_semantics = [#tpu.dimension_semantics<parallel>], iteration_bounds = array<i64: 1>, scalar_prefetch = 0 : i64, scratch_operands = 1 : i64, tpu.core_type = #tpu.core_type<tc>, window_params = [{transform_indices = @transform_0, window_bounds = array<i64: 32, 64>}, {pipeline_mode = #tpu.pipeline_mode<synchronous>, transform_indices = @transform_1, window_bounds = array<i64: 64, 192>}, {pipeline_mode = #tpu.pipeline_mode<synchronous>, transform_indices = @transform_2, window_bounds = array<i64: 1, 192>}, {pipeline_mode = #tpu.pipeline_mode<synchronous>, transform_indices = @transform_3, window_bounds = array<i64: 64, 64>}, {pipeline_mode = #tpu.pipeline_mode<synchronous>, transform_indices = @transform_4, window_bounds = array<i64: 1, 64>}, {transform_indices = @transform_5, window_bounds = array<i64: 32, 64>}]} {
    %c0 = arith.constant 0 : index
    %c0_0 = arith.constant 0 : index
    %0 = vector.load %arg1[%c0, %c0_0] : memref<32x64xf32, #tpu.memory_space<vmem>>, vector<32x64xf32>
    %c0_1 = arith.constant 0 : index
    %c0_2 = arith.constant 0 : index
    %1 = vector.load %arg2[%c0_1, %c0_2] : memref<64x192xf32, #tpu.memory_space<vmem>>, vector<64x192xf32>
    %c0_3 = arith.constant 0 : index
    %c0_4 = arith.constant 0 : index
    %2 = vector.load %arg4[%c0_3, %c0_4] : memref<64x64xf32, #tpu.memory_space<vmem>>, vector<64x64xf32>
    %c0_5 = arith.constant 0 : index
    %c0_6 = arith.constant 0 : index
    %3 = vector.load %arg3[%c0_5, %c0_6] : memref<1x192xf32, #tpu.memory_space<vmem>>, vector<1x192xf32>
    %c0_7 = arith.constant 0 : index
    %c0_8 = arith.constant 0 : index
    %4 = vector.load %arg5[%c0_7, %c0_8] : memref<1x64xf32, #tpu.memory_space<vmem>>, vector<1x64xf32>
    %cst = arith.constant dense<0.000000e+00> : vector<32x192xf32>
    %5 = tpu.matmul %0, %1, %cst {dimension_numbers = #tpu.dot_dimension_numbers<[1], [0], [0], [1], [0, 0, 1, 1], [], []>} : vector<32x64xf32>, vector<64x192xf32>, vector<32x192xf32> -> vector<32x192xf32>
    %6 = vector.broadcast %3 : vector<1x192xf32> to vector<32x192xf32>
    %7 = arith.addf %5, %6 : vector<32x192xf32>
    %8 = vector.shape_cast %7 : vector<32x192xf32> to vector<2x16x192xf32>
    %9 = vector.extract_strided_slice %8 {offsets = [0, 0, 0], sizes = [2, 16, 64], strides = [1, 1, 1]} : vector<2x16x192xf32> to vector<2x16x64xf32>
    %10 = vector.extract_strided_slice %8 {offsets = [0, 0, 64], sizes = [2, 16, 64], strides = [1, 1, 1]} : vector<2x16x192xf32> to vector<2x16x64xf32>
    %11 = vector.extract_strided_slice %8 {offsets = [0, 0, 128], sizes = [2, 16, 64], strides = [1, 1, 1]} : vector<2x16x192xf32> to vector<2x16x64xf32>
    %12 = vector.extract_strided_slice %9 {offsets = [0, 0, 0], sizes = [2, 16, 8], strides = [1, 1, 1]} : vector<2x16x64xf32> to vector<2x16x8xf32>
    %13 = vector.extract_strided_slice %10 {offsets = [0, 0, 0], sizes = [2, 16, 8], strides = [1, 1, 1]} : vector<2x16x64xf32> to vector<2x16x8xf32>
    %14 = vector.extract_strided_slice %11 {offsets = [0, 0, 0], sizes = [2, 16, 8], strides = [1, 1, 1]} : vector<2x16x64xf32> to vector<2x16x8xf32>
    "tpu.trace_start"() <{level = 10 : i32, message = "bqc,bkc->bqk"}> : () -> ()
    %cst_9 = arith.constant dense<0.000000e+00> : vector<2x16x16xf32>
    %15 = tpu.matmul %12, %13, %cst_9 {dimension_numbers = #tpu.dot_dimension_numbers<[2], [2], [1], [1], [0, 0, 0, 1, 1, 1], [0], [0]>} : vector<2x16x8xf32>, vector<2x16x8xf32>, vector<2x16x16xf32> -> vector<2x16x16xf32>
    "tpu.trace_stop"() : () -> ()
    %cst_10 = arith.constant dense<0xFF800000> : vector<2x16xf32>
    %16 = vector.multi_reduction <maximumf>, %15, %cst_10 [2] : vector<2x16x16xf32> to vector<2x16xf32>
    %17 = vector.shape_cast %16 : vector<2x16xf32> to vector<2x16x1xf32>
    %18 = vector.broadcast %17 : vector<2x16x1xf32> to vector<2x16x16xf32>
    %19 = arith.subf %15, %18 : vector<2x16x16xf32>
    %20 = math.exp %19 : vector<2x16x16xf32>
    %cst_11 = arith.constant dense<0.000000e+00> : vector<2x16xf32>
    %21 = vector.multi_reduction <add>, %20, %cst_11 [2] : vector<2x16x16xf32> to vector<2x16xf32>
    %22 = vector.shape_cast %21 : vector<2x16xf32> to vector<2x16x1xf32>
    %23 = tpu.reciprocal %22 {approx = true} : vector<2x16x1xf32> -> vector<2x16x1xf32>
    %24 = vector.broadcast %23 : vector<2x16x1xf32> to vector<2x16x16xf32>
    %25 = arith.mulf %20, %24 : vector<2x16x16xf32>
    "tpu.trace_start"() <{level = 10 : i32, message = "bqk,bkc->bqc"}> : () -> ()
    %cst_12 = arith.constant dense<0.000000e+00> : vector<2x16x8xf32>
    %26 = tpu.matmul %25, %14, %cst_12 {dimension_numbers = #tpu.dot_dimension_numbers<[2], [1], [1], [2], [0, 0, 0, 1, 1, 2], [0], [0]>} : vector<2x16x16xf32>, vector<2x16x8xf32>, vector<2x16x8xf32> -> vector<2x16x8xf32>
    "tpu.trace_stop"() : () -> ()
    %c0_13 = arith.constant 0 : index
    %c0_14 = arith.constant 0 : index
    %c0_15 = arith.constant 0 : index
    %27 = vector.load %arg7[%c0_13, %c0_14, %c0_15] : memref<2x16x64xf32, #tpu.memory_space<vmem>>, vector<2x16x8xf32>
    tpu.vector_store %arg7[%c0_13, %c0_14, %c0_15], %26 {strides = array<i32>} : memref<2x16x64xf32, #tpu.memory_space<vmem>>, vector<2x16x8xf32>,
    %28 = vector.extract_strided_slice %9 {offsets = [0, 0, 8], sizes = [2, 16, 8], strides = [1, 1, 1]} : vector<2x16x64xf32> to vector<2x16x8xf32>
    %29 = vector.extract_strided_slice %10 {offsets = [0, 0, 8], sizes = [2, 16, 8], strides = [1, 1, 1]} : vector<2x16x64xf32> to vector<2x16x8xf32>
    %30 = vector.extract_strided_slice %11 {offsets = [0, 0, 8], sizes = [2, 16, 8], strides = [1, 1, 1]} : vector<2x16x64xf32> to vector<2x16x8xf32>
    "tpu.trace_start"() <{level = 10 : i32, message = "bqc,bkc->bqk"}> : () -> ()
    %cst_16 = arith.constant dense<0.000000e+00> : vector<2x16x16xf32>
    %31 = tpu.matmul %28, %29, %cst_16 {dimension_numbers = #tpu.dot_dimension_numbers<[2], [2], [1], [1], [0, 0, 0, 1, 1, 1], [0], [0]>} : vector<2x16x8xf32>, vector<2x16x8xf32>, vector<2x16x16xf32> -> vector<2x16x16xf32>
    "tpu.trace_stop"() : () -> ()
    %cst_17 = arith.constant dense<0xFF800000> : vector<2x16xf32>
    %32 = vector.multi_reduction <maximumf>, %31, %cst_17 [2] : vector<2x16x16xf32> to vector<2x16xf32>
    %33 = vector.shape_cast %32 : vector<2x16xf32> to vector<2x16x1xf32>
    %34 = vector.broadcast %33 : vector<2x16x1xf32> to vector<2x16x16xf32>
    %35 = arith.subf %31, %34 : vector<2x16x16xf32>
    %36 = math.exp %35 : vector<2x16x16xf32>
    %cst_18 = arith.constant dense<0.000000e+00> : vector<2x16xf32>
    %37 = vector.multi_reduction <add>, %36, %cst_18 [2] : vector<2x16x16xf32> to vector<2x16xf32>
    %38 = vector.shape_cast %37 : vector<2x16xf32> to vector<2x16x1xf32>
    %39 = tpu.reciprocal %38 {approx = true} : vector<2x16x1xf32> -> vector<2x16x1xf32>
    %40 = vector.broadcast %39 : vector<2x16x1xf32> to vector<2x16x16xf32>
    %41 = arith.mulf %36, %40 : vector<2x16x16xf32>
    "tpu.trace_start"() <{level = 10 : i32, message = "bqk,bkc->bqc"}> : () -> ()
    %cst_19 = arith.constant dense<0.000000e+00> : vector<2x16x8xf32>
    %42 = tpu.matmul %41, %30, %cst_19 {dimension_numbers = #tpu.dot_dimension_numbers<[2], [1], [1], [2], [0, 0, 0, 1, 1, 2], [0], [0]>} : vector<2x16x16xf32>, vector<2x16x8xf32>, vector<2x16x8xf32> -> vector<2x16x8xf32>
    "tpu.trace_stop"() : () -> ()
    %c0_20 = arith.constant 0 : index
    %c0_21 = arith.constant 0 : index
    %c8 = arith.constant 8 : index
    %43 = vector.load %arg7[%c0_20, %c0_21, %c8] : memref<2x16x64xf32, #tpu.memory_space<vmem>>, vector<2x16x8xf32>
    tpu.vector_store %arg7[%c0_20, %c0_21, %c8], %42 {strides = array<i32>} : memref<2x16x64xf32, #tpu.memory_space<vmem>>, vector<2x16x8xf32>,
    %44 = vector.extract_strided_slice %9 {offsets = [0, 0, 16], sizes = [2, 16, 8], strides = [1, 1, 1]} : vector<2x16x64xf32> to vector<2x16x8xf32>
    %45 = vector.extract_strided_slice %10 {offsets = [0, 0, 16], sizes = [2, 16, 8], strides = [1, 1, 1]} : vector<2x16x64xf32> to vector<2x16x8xf32>
    %46 = vector.extract_strided_slice %11 {offsets = [0, 0, 16], sizes = [2, 16, 8], strides = [1, 1, 1]} : vector<2x16x64xf32> to vector<2x16x8xf32>
    "tpu.trace_start"() <{level = 10 : i32, message = "bqc,bkc->bqk"}> : () -> ()
    %cst_22 = arith.constant dense<0.000000e+00> : vector<2x16x16xf32>
    %47 = tpu.matmul %44, %45, %cst_22 {dimension_numbers = #tpu.dot_dimension_numbers<[2], [2], [1], [1], [0, 0, 0, 1, 1, 1], [0], [0]>} : vector<2x16x8xf32>, vector<2x16x8xf32>, vector<2x16x16xf32> -> vector<2x16x16xf32>
    "tpu.trace_stop"() : () -> ()
    %cst_23 = arith.constant dense<0xFF800000> : vector<2x16xf32>
    %48 = vector.multi_reduction <maximumf>, %47, %cst_23 [2] : vector<2x16x16xf32> to vector<2x16xf32>
    %49 = vector.shape_cast %48 : vector<2x16xf32> to vector<2x16x1xf32>
    %50 = vector.broadcast %49 : vector<2x16x1xf32> to vector<2x16x16xf32>
    %51 = arith.subf %47, %50 : vector<2x16x16xf32>
    %52 = math.exp %51 : vector<2x16x16xf32>
    %cst_24 = arith.constant dense<0.000000e+00> : vector<2x16xf32>
    %53 = vector.multi_reduction <add>, %52, %cst_24 [2] : vector<2x16x16xf32> to vector<2x16xf32>
    %54 = vector.shape_cast %53 : vector<2x16xf32> to vector<2x16x1xf32>
    %55 = tpu.reciprocal %54 {approx = true} : vector<2x16x1xf32> -> vector<2x16x1xf32>
    %56 = vector.broadcast %55 : vector<2x16x1xf32> to vector<2x16x16xf32>
    %57 = arith.mulf %52, %56 : vector<2x16x16xf32>
    "tpu.trace_start"() <{level = 10 : i32, message = "bqk,bkc->bqc"}> : () -> ()
    %cst_25 = arith.constant dense<0.000000e+00> : vector<2x16x8xf32>
    %58 = tpu.matmul %57, %46, %cst_25 {dimension_numbers = #tpu.dot_dimension_numbers<[2], [1], [1], [2], [0, 0, 0, 1, 1, 2], [0], [0]>} : vector<2x16x16xf32>, vector<2x16x8xf32>, vector<2x16x8xf32> -> vector<2x16x8xf32>
    "tpu.trace_stop"() : () -> ()
    %c0_26 = arith.constant 0 : index
    %c0_27 = arith.constant 0 : index
    %c16 = arith.constant 16 : index
    %59 = vector.load %arg7[%c0_26, %c0_27, %c16] : memref<2x16x64xf32, #tpu.memory_space<vmem>>, vector<2x16x8xf32>
    tpu.vector_store %arg7[%c0_26, %c0_27, %c16], %58 {strides = array<i32>} : memref<2x16x64xf32, #tpu.memory_space<vmem>>, vector<2x16x8xf32>,
    %60 = vector.extract_strided_slice %9 {offsets = [0, 0, 24], sizes = [2, 16, 8], strides = [1, 1, 1]} : vector<2x16x64xf32> to vector<2x16x8xf32>
    %61 = vector.extract_strided_slice %10 {offsets = [0, 0, 24], sizes = [2, 16, 8], strides = [1, 1, 1]} : vector<2x16x64xf32> to vector<2x16x8xf32>
    %62 = vector.extract_strided_slice %11 {offsets = [0, 0, 24], sizes = [2, 16, 8], strides = [1, 1, 1]} : vector<2x16x64xf32> to vector<2x16x8xf32>
    "tpu.trace_start"() <{level = 10 : i32, message = "bqc,bkc->bqk"}> : () -> ()
    %cst_28 = arith.constant dense<0.000000e+00> : vector<2x16x16xf32>
    %63 = tpu.matmul %60, %61, %cst_28 {dimension_numbers = #tpu.dot_dimension_numbers<[2], [2], [1], [1], [0, 0, 0, 1, 1, 1], [0], [0]>} : vector<2x16x8xf32>, vector<2x16x8xf32>, vector<2x16x16xf32> -> vector<2x16x16xf32>
    "tpu.trace_stop"() : () -> ()
    %cst_29 = arith.constant dense<0xFF800000> : vector<2x16xf32>
    %64 = vector.multi_reduction <maximumf>, %63, %cst_29 [2] : vector<2x16x16xf32> to vector<2x16xf32>
    %65 = vector.shape_cast %64 : vector<2x16xf32> to vector<2x16x1xf32>
    %66 = vector.broadcast %65 : vector<2x16x1xf32> to vector<2x16x16xf32>
    %67 = arith.subf %63, %66 : vector<2x16x16xf32>
    %68 = math.exp %67 : vector<2x16x16xf32>
    %cst_30 = arith.constant dense<0.000000e+00> : vector<2x16xf32>
    %69 = vector.multi_reduction <add>, %68, %cst_30 [2] : vector<2x16x16xf32> to vector<2x16xf32>
    %70 = vector.shape_cast %69 : vector<2x16xf32> to vector<2x16x1xf32>
    %71 = tpu.reciprocal %70 {approx = true} : vector<2x16x1xf32> -> vector<2x16x1xf32>
    %72 = vector.broadcast %71 : vector<2x16x1xf32> to vector<2x16x16xf32>
    %73 = arith.mulf %68, %72 : vector<2x16x16xf32>
    "tpu.trace_start"() <{level = 10 : i32, message = "bqk,bkc->bqc"}> : () -> ()
    %cst_31 = arith.constant dense<0.000000e+00> : vector<2x16x8xf32>
    %74 = tpu.matmul %73, %62, %cst_31 {dimension_numbers = #tpu.dot_dimension_numbers<[2], [1], [1], [2], [0, 0, 0, 1, 1, 2], [0], [0]>} : vector<2x16x16xf32>, vector<2x16x8xf32>, vector<2x16x8xf32> -> vector<2x16x8xf32>
    "tpu.trace_stop"() : () -> ()
    %c0_32 = arith.constant 0 : index
    %c0_33 = arith.constant 0 : index
    %c24 = arith.constant 24 : index
    %75 = vector.load %arg7[%c0_32, %c0_33, %c24] : memref<2x16x64xf32, #tpu.memory_space<vmem>>, vector<2x16x8xf32>
    tpu.vector_store %arg7[%c0_32, %c0_33, %c24], %74 {strides = array<i32>} : memref<2x16x64xf32, #tpu.memory_space<vmem>>, vector<2x16x8xf32>,
    %76 = vector.extract_strided_slice %9 {offsets = [0, 0, 32], sizes = [2, 16, 8], strides = [1, 1, 1]} : vector<2x16x64xf32> to vector<2x16x8xf32>
    %77 = vector.extract_strided_slice %10 {offsets = [0, 0, 32], sizes = [2, 16, 8], strides = [1, 1, 1]} : vector<2x16x64xf32> to vector<2x16x8xf32>
    %78 = vector.extract_strided_slice %11 {offsets = [0, 0, 32], sizes = [2, 16, 8], strides = [1, 1, 1]} : vector<2x16x64xf32> to vector<2x16x8xf32>
    "tpu.trace_start"() <{level = 10 : i32, message = "bqc,bkc->bqk"}> : () -> ()
    %cst_34 = arith.constant dense<0.000000e+00> : vector<2x16x16xf32>
    %79 = tpu.matmul %76, %77, %cst_34 {dimension_numbers = #tpu.dot_dimension_numbers<[2], [2], [1], [1], [0, 0, 0, 1, 1, 1], [0], [0]>} : vector<2x16x8xf32>, vector<2x16x8xf32>, vector<2x16x16xf32> -> vector<2x16x16xf32>
    "tpu.trace_stop"() : () -> ()
    %cst_35 = arith.constant dense<0xFF800000> : vector<2x16xf32>
    %80 = vector.multi_reduction <maximumf>, %79, %cst_35 [2] : vector<2x16x16xf32> to vector<2x16xf32>
    %81 = vector.shape_cast %80 : vector<2x16xf32> to vector<2x16x1xf32>
    %82 = vector.broadcast %81 : vector<2x16x1xf32> to vector<2x16x16xf32>
    %83 = arith.subf %79, %82 : vector<2x16x16xf32>
    %84 = math.exp %83 : vector<2x16x16xf32>
    %cst_36 = arith.constant dense<0.000000e+00> : vector<2x16xf32>
    %85 = vector.multi_reduction <add>, %84, %cst_36 [2] : vector<2x16x16xf32> to vector<2x16xf32>
    %86 = vector.shape_cast %85 : vector<2x16xf32> to vector<2x16x1xf32>
    %87 = tpu.reciprocal %86 {approx = true} : vector<2x16x1xf32> -> vector<2x16x1xf32>
    %88 = vector.broadcast %87 : vector<2x16x1xf32> to vector<2x16x16xf32>
    %89 = arith.mulf %84, %88 : vector<2x16x16xf32>
    "tpu.trace_start"() <{level = 10 : i32, message = "bqk,bkc->bqc"}> : () -> ()
    %cst_37 = arith.constant dense<0.000000e+00> : vector<2x16x8xf32>
    %90 = tpu.matmul %89, %78, %cst_37 {dimension_numbers = #tpu.dot_dimension_numbers<[2], [1], [1], [2], [0, 0, 0, 1, 1, 2], [0], [0]>} : vector<2x16x16xf32>, vector<2x16x8xf32>, vector<2x16x8xf32> -> vector<2x16x8xf32>
    "tpu.trace_stop"() : () -> ()
    %c0_38 = arith.constant 0 : index
    %c0_39 = arith.constant 0 : index
    %c32 = arith.constant 32 : index
    %91 = vector.load %arg7[%c0_38, %c0_39, %c32] : memref<2x16x64xf32, #tpu.memory_space<vmem>>, vector<2x16x8xf32>
    tpu.vector_store %arg7[%c0_38, %c0_39, %c32], %90 {strides = array<i32>} : memref<2x16x64xf32, #tpu.memory_space<vmem>>, vector<2x16x8xf32>,
    %92 = vector.extract_strided_slice %9 {offsets = [0, 0, 40], sizes = [2, 16, 8], strides = [1, 1, 1]} : vector<2x16x64xf32> to vector<2x16x8xf32>
    %93 = vector.extract_strided_slice %10 {offsets = [0, 0, 40], sizes = [2, 16, 8], strides = [1, 1, 1]} : vector<2x16x64xf32> to vector<2x16x8xf32>
    %94 = vector.extract_strided_slice %11 {offsets = [0, 0, 40], sizes = [2, 16, 8], strides = [1, 1, 1]} : vector<2x16x64xf32> to vector<2x16x8xf32>
    "tpu.trace_start"() <{level = 10 : i32, message = "bqc,bkc->bqk"}> : () -> ()
    %cst_40 = arith.constant dense<0.000000e+00> : vector<2x16x16xf32>
    %95 = tpu.matmul %92, %93, %cst_40 {dimension_numbers = #tpu.dot_dimension_numbers<[2], [2], [1], [1], [0, 0, 0, 1, 1, 1], [0], [0]>} : vector<2x16x8xf32>, vector<2x16x8xf32>, vector<2x16x16xf32> -> vector<2x16x16xf32>
    "tpu.trace_stop"() : () -> ()
    %cst_41 = arith.constant dense<0xFF800000> : vector<2x16xf32>
    %96 = vector.multi_reduction <maximumf>, %95, %cst_41 [2] : vector<2x16x16xf32> to vector<2x16xf32>
    %97 = vector.shape_cast %96 : vector<2x16xf32> to vector<2x16x1xf32>
    %98 = vector.broadcast %97 : vector<2x16x1xf32> to vector<2x16x16xf32>
    %99 = arith.subf %95, %98 : vector<2x16x16xf32>
    %100 = math.exp %99 : vector<2x16x16xf32>
    %cst_42 = arith.constant dense<0.000000e+00> : vector<2x16xf32>
    %101 = vector.multi_reduction <add>, %100, %cst_42 [2] : vector<2x16x16xf32> to vector<2x16xf32>
    %102 = vector.shape_cast %101 : vector<2x16xf32> to vector<2x16x1xf32>
    %103 = tpu.reciprocal %102 {approx = true} : vector<2x16x1xf32> -> vector<2x16x1xf32>
    %104 = vector.broadcast %103 : vector<2x16x1xf32> to vector<2x16x16xf32>
    %105 = arith.mulf %100, %104 : vector<2x16x16xf32>
    "tpu.trace_start"() <{level = 10 : i32, message = "bqk,bkc->bqc"}> : () -> ()
    %cst_43 = arith.constant dense<0.000000e+00> : vector<2x16x8xf32>
    %106 = tpu.matmul %105, %94, %cst_43 {dimension_numbers = #tpu.dot_dimension_numbers<[2], [1], [1], [2], [0, 0, 0, 1, 1, 2], [0], [0]>} : vector<2x16x16xf32>, vector<2x16x8xf32>, vector<2x16x8xf32> -> vector<2x16x8xf32>
    "tpu.trace_stop"() : () -> ()
    %c0_44 = arith.constant 0 : index
    %c0_45 = arith.constant 0 : index
    %c40 = arith.constant 40 : index
    %107 = vector.load %arg7[%c0_44, %c0_45, %c40] : memref<2x16x64xf32, #tpu.memory_space<vmem>>, vector<2x16x8xf32>
    tpu.vector_store %arg7[%c0_44, %c0_45, %c40], %106 {strides = array<i32>} : memref<2x16x64xf32, #tpu.memory_space<vmem>>, vector<2x16x8xf32>,
    %108 = vector.extract_strided_slice %9 {offsets = [0, 0, 48], sizes = [2, 16, 8], strides = [1, 1, 1]} : vector<2x16x64xf32> to vector<2x16x8xf32>
    %109 = vector.extract_strided_slice %10 {offsets = [0, 0, 48], sizes = [2, 16, 8], strides = [1, 1, 1]} : vector<2x16x64xf32> to vector<2x16x8xf32>
    %110 = vector.extract_strided_slice %11 {offsets = [0, 0, 48], sizes = [2, 16, 8], strides = [1, 1, 1]} : vector<2x16x64xf32> to vector<2x16x8xf32>
    "tpu.trace_start"() <{level = 10 : i32, message = "bqc,bkc->bqk"}> : () -> ()
    %cst_46 = arith.constant dense<0.000000e+00> : vector<2x16x16xf32>
    %111 = tpu.matmul %108, %109, %cst_46 {dimension_numbers = #tpu.dot_dimension_numbers<[2], [2], [1], [1], [0, 0, 0, 1, 1, 1], [0], [0]>} : vector<2x16x8xf32>, vector<2x16x8xf32>, vector<2x16x16xf32> -> vector<2x16x16xf32>
    "tpu.trace_stop"() : () -> ()
    %cst_47 = arith.constant dense<0xFF800000> : vector<2x16xf32>
    %112 = vector.multi_reduction <maximumf>, %111, %cst_47 [2] : vector<2x16x16xf32> to vector<2x16xf32>
    %113 = vector.shape_cast %112 : vector<2x16xf32> to vector<2x16x1xf32>
    %114 = vector.broadcast %113 : vector<2x16x1xf32> to vector<2x16x16xf32>
    %115 = arith.subf %111, %114 : vector<2x16x16xf32>
    %116 = math.exp %115 : vector<2x16x16xf32>
    %cst_48 = arith.constant dense<0.000000e+00> : vector<2x16xf32>
    %117 = vector.multi_reduction <add>, %116, %cst_48 [2] : vector<2x16x16xf32> to vector<2x16xf32>
    %118 = vector.shape_cast %117 : vector<2x16xf32> to vector<2x16x1xf32>
    %119 = tpu.reciprocal %118 {approx = true} : vector<2x16x1xf32> -> vector<2x16x1xf32>
    %120 = vector.broadcast %119 : vector<2x16x1xf32> to vector<2x16x16xf32>
    %121 = arith.mulf %116, %120 : vector<2x16x16xf32>
    "tpu.trace_start"() <{level = 10 : i32, message = "bqk,bkc->bqc"}> : () -> ()
    %cst_49 = arith.constant dense<0.000000e+00> : vector<2x16x8xf32>
    %122 = tpu.matmul %121, %110, %cst_49 {dimension_numbers = #tpu.dot_dimension_numbers<[2], [1], [1], [2], [0, 0, 0, 1, 1, 2], [0], [0]>} : vector<2x16x16xf32>, vector<2x16x8xf32>, vector<2x16x8xf32> -> vector<2x16x8xf32>
    "tpu.trace_stop"() : () -> ()
    %c0_50 = arith.constant 0 : index
    %c0_51 = arith.constant 0 : index
    %c48 = arith.constant 48 : index
    %123 = vector.load %arg7[%c0_50, %c0_51, %c48] : memref<2x16x64xf32, #tpu.memory_space<vmem>>, vector<2x16x8xf32>
    tpu.vector_store %arg7[%c0_50, %c0_51, %c48], %122 {strides = array<i32>} : memref<2x16x64xf32, #tpu.memory_space<vmem>>, vector<2x16x8xf32>,
    %124 = vector.extract_strided_slice %9 {offsets = [0, 0, 56], sizes = [2, 16, 8], strides = [1, 1, 1]} : vector<2x16x64xf32> to vector<2x16x8xf32>
    %125 = vector.extract_strided_slice %10 {offsets = [0, 0, 56], sizes = [2, 16, 8], strides = [1, 1, 1]} : vector<2x16x64xf32> to vector<2x16x8xf32>
    %126 = vector.extract_strided_slice %11 {offsets = [0, 0, 56], sizes = [2, 16, 8], strides = [1, 1, 1]} : vector<2x16x64xf32> to vector<2x16x8xf32>
    "tpu.trace_start"() <{level = 10 : i32, message = "bqc,bkc->bqk"}> : () -> ()
    %cst_52 = arith.constant dense<0.000000e+00> : vector<2x16x16xf32>
    %127 = tpu.matmul %124, %125, %cst_52 {dimension_numbers = #tpu.dot_dimension_numbers<[2], [2], [1], [1], [0, 0, 0, 1, 1, 1], [0], [0]>} : vector<2x16x8xf32>, vector<2x16x8xf32>, vector<2x16x16xf32> -> vector<2x16x16xf32>
    "tpu.trace_stop"() : () -> ()
    %cst_53 = arith.constant dense<0xFF800000> : vector<2x16xf32>
    %128 = vector.multi_reduction <maximumf>, %127, %cst_53 [2] : vector<2x16x16xf32> to vector<2x16xf32>
    %129 = vector.shape_cast %128 : vector<2x16xf32> to vector<2x16x1xf32>
    %130 = vector.broadcast %129 : vector<2x16x1xf32> to vector<2x16x16xf32>
    %131 = arith.subf %127, %130 : vector<2x16x16xf32>
    %132 = math.exp %131 : vector<2x16x16xf32>
    %cst_54 = arith.constant dense<0.000000e+00> : vector<2x16xf32>
    %133 = vector.multi_reduction <add>, %132, %cst_54 [2] : vector<2x16x16xf32> to vector<2x16xf32>
    %134 = vector.shape_cast %133 : vector<2x16xf32> to vector<2x16x1xf32>
    %135 = tpu.reciprocal %134 {approx = true} : vector<2x16x1xf32> -> vector<2x16x1xf32>
    %136 = vector.broadcast %135 : vector<2x16x1xf32> to vector<2x16x16xf32>
    %137 = arith.mulf %132, %136 : vector<2x16x16xf32>
    "tpu.trace_start"() <{level = 10 : i32, message = "bqk,bkc->bqc"}> : () -> ()
    %cst_55 = arith.constant dense<0.000000e+00> : vector<2x16x8xf32>
    %138 = tpu.matmul %137, %126, %cst_55 {dimension_numbers = #tpu.dot_dimension_numbers<[2], [1], [1], [2], [0, 0, 0, 1, 1, 2], [0], [0]>} : vector<2x16x16xf32>, vector<2x16x8xf32>, vector<2x16x8xf32> -> vector<2x16x8xf32>
    "tpu.trace_stop"() : () -> ()
    %c0_56 = arith.constant 0 : index
    %c0_57 = arith.constant 0 : index
    %c56 = arith.constant 56 : index
    %139 = vector.load %arg7[%c0_56, %c0_57, %c56] : memref<2x16x64xf32, #tpu.memory_space<vmem>>, vector<2x16x8xf32>
    tpu.vector_store %arg7[%c0_56, %c0_57, %c56], %138 {strides = array<i32>} : memref<2x16x64xf32, #tpu.memory_space<vmem>>, vector<2x16x8xf32>,
    %c0_58 = arith.constant 0 : index
    %c0_59 = arith.constant 0 : index
    %c0_60 = arith.constant 0 : index
    %140 = vector.load %arg7[%c0_58, %c0_59, %c0_60] : memref<2x16x64xf32, #tpu.memory_space<vmem>>, vector<2x16x64xf32>
    %141 = vector.shape_cast %140 : vector<2x16x64xf32> to vector<32x64xf32>
    %cst_61 = arith.constant dense<0.000000e+00> : vector<32x64xf32>
    %142 = tpu.matmul %141, %2, %cst_61 {dimension_numbers = #tpu.dot_dimension_numbers<[1], [0], [0], [1], [0, 0, 1, 1], [], []>} : vector<32x64xf32>, vector<64x64xf32>, vector<32x64xf32> -> vector<32x64xf32>
    %143 = vector.broadcast %4 : vector<1x64xf32> to vector<32x64xf32>
    %144 = arith.addf %142, %143 : vector<32x64xf32>
    %c0_62 = arith.constant 0 : index
    %c0_63 = arith.constant 0 : index
    %145 = vector.load %arg6[%c0_62, %c0_63] : memref<32x64xf32, #tpu.memory_space<vmem>>, vector<32x64xf32>
    tpu.vector_store %arg6[%c0_62, %c0_63], %144 {strides = array<i32>} : memref<32x64xf32, #tpu.memory_space<vmem>>, vector<32x64xf32>,
    return
  }
  func.func @transform_0(%arg0: i32) -> (i32, i32) {
    %c0_i32 = arith.constant 0 : i32
    %c0_i32_0 = arith.constant 0 : i32
    return %arg0, %c0_i32 : i32, i32
  }
  func.func @transform_1(%arg0: i32) -> (i32, i32) {
    %c0_i32 = arith.constant 0 : i32
    %c0_i32_0 = arith.constant 0 : i32
    %c0_i32_1 = arith.constant 0 : i32
    return %c0_i32, %c0_i32_0 : i32, i32
  }
  func.func @transform_2(%arg0: i32) -> (i32, i32) {
    %c0_i32 = arith.constant 0 : i32
    %c0_i32_0 = arith.constant 0 : i32
    %c0_i32_1 = arith.constant 0 : i32
    return %c0_i32, %c0_i32_0 : i32, i32
  }
  func.func @transform_3(%arg0: i32) -> (i32, i32) {
    %c0_i32 = arith.constant 0 : i32
    %c0_i32_0 = arith.constant 0 : i32
    %c0_i32_1 = arith.constant 0 : i32
    return %c0_i32, %c0_i32_0 : i32, i32
  }
  func.func @transform_4(%arg0: i32) -> (i32, i32) {
    %c0_i32 = arith.constant 0 : i32
    %c0_i32_0 = arith.constant 0 : i32
    %c0_i32_1 = arith.constant 0 : i32
    return %c0_i32, %c0_i32_0 : i32, i32
  }
  func.func @transform_5(%arg0: i32) -> (i32, i32) {
    %c0_i32 = arith.constant 0 : i32
    %c0_i32_0 = arith.constant 0 : i32
    return %arg0, %c0_i32 : i32, i32
  }
}

</mosaic_0001>

<bundles_post_ra>
// kernel: tpu_custom_call.1
= control target key start
LH: loop header
LB: loop body
LE: loop exit
PB: predicated region body
PF: predicated region fallthrough
CT: control target
= control target key end

     0   :  { %10 = vsyncpa [#allocation4], 0  ;;  %s5359_s0 = inlined_call_operand.hbm [shape: f32[32,64], index: 0, kind: input, shape index: {}]   ;;  %s5360_s1 = inlined_call_operand.hbm [shape: f32[64,192], index: 1, kind: input, shape index: {}]   ;;  %s5361_s2 = inlined_call_operand.vmem [shape: f32[1,192], index: 2, kind: input, shape index: {}]   ;;  %s5362_s3 = inlined_call_operand.hbm [shape: f32[64,64], index: 3, kind: input, shape index: {}]   ;;  %s5363_s4 = inlined_call_operand.vmem [shape: f32[1,64], index: 4, kind: input, shape index: {}]   ;;  %s5364_s5 = inlined_call_operand.hbm [shape: f32[32,64], index: 5, kind: output, shape index: {}]  }
   0x1   :  { %11 = vsyncpa [#allocation7], 0 }
   0x2   :  { %12 = vsyncpa [#allocation5], 0  ;;  %s4752_s18 = smov [#allocation6]   ;;  %s4658_s22 = scalar_lea.hbm %s5360_s1, 2048 }
   0x3   :  { %s30_s19 = sshll.u32 %s4752_s18, 4  ;;  %p4659_p0 = scmp.ne.s32.totalorder %s5360_s1, %s4658_s22  ;;  %s31_s19 = int_to_ptr.vmem [resolvable:$true] %s30_s19 }
   0x4   :  { %p4662_p1 = scmp.lt.u32.totalorder %s4658_s22, %s5360_s1 }
   0x6   :  { %p4664_p2 = pnand %p4662_p1, %p4659_p0 }
   0x8   :  { %4667 = shalt.err (!%p4664_p2)
}
   0x9   :  { %s4668_s27 = scalar_lea.vmem %s31_s19, 2048  ;;  %p4673_p4 = scmp.lt.s32.totalorder %s31_s19, %s31_s19 }
   0xa   :  { %p4669_p3 = scmp.ne.s32.totalorder %s31_s19, %s4668_s27  ;;  %p4674_p5 = scmp.lt.s32.totalorder %s4668_s27, %s4668_s27 }
   0xc   :  { %p4675_p6 = por %p4674_p5, %p4673_p4 }
   0xe   :  { %p4676_p7 = pnand %p4675_p6, %p4669_p3 }
  0x10   :  { %4679 = shalt.err (!%p4676_p7)
}
  0x11   :  { %s4753_s28 = smov 256   ;;  %s4754_s29 = smov 16  }
  0x12   :  { %36 = dma.hbm_to_vmem [thread:$0]  %s5360_s1, 2048, %s31_s19, [#allocation7], %s4753_s28, %s4753_s28, %s4754_s29  }
  0x13   :  { %s4755_s7 = smov [#allocation3]   ;;  %s4680_s11 = scalar_lea.hbm %s5359_s0, 512 }
  0x14   :  { %s18_s8 = sshll.u32 %s4755_s7, 4  ;;  %p4681_p8 = scmp.ne.s32.totalorder %s5359_s0, %s4680_s11  ;;  %s19_s8 = int_to_ptr.vmem [resolvable:$true] %s18_s8 }
  0x15   :  { %p4684_p9 = scmp.lt.u32.totalorder %s4680_s11, %s5359_s0 }
  0x17   :  { %p4686_p10 = pnand %p4684_p9, %p4681_p8 }
  0x19   :  { %4689 = shalt.err (!%p4686_p10)
}
  0x1a   :  { %s4690_s16 = scalar_lea.vmem %s19_s8, 512  ;;  %p4695_p12 = scmp.lt.s32.totalorder %s19_s8, %s19_s8 }
  0x1b   :  { %p4691_p11 = scmp.ne.s32.totalorder %s19_s8, %s4690_s16  ;;  %p4696_p13 = scmp.lt.s32.totalorder %s4690_s16, %s4690_s16 }
  0x1d   :  { %p4697_p0 = por %p4696_p13, %p4695_p12 }
  0x1f   :  { %p4698_p1 = pnand %p4697_p0, %p4691_p11 }
  0x21   :  { %4701 = shalt.err (!%p4698_p1)
}
  0x22   :  { %s4756_s1 = smov 128   ;;  %s4757_s17 = smov 8  }
  0x23   :  { %24 = dma.hbm_to_vmem [thread:$0]  %s5359_s0, 512, %s19_s8, [#allocation4], %s4756_s1, %s4756_s1, %s4757_s17  }
  0x24   :  { %s4758_s20 = smov [#allocation8]   ;;  %s4702_s24 = scalar_lea.hbm %s5362_s3, 1024 }
  0x25   :  { %s44_s21 = sshll.u32 %s4758_s20, 4  ;;  %p4703_p2 = scmp.ne.s32.totalorder %s5362_s3, %s4702_s24  ;;  %s45_s21 = int_to_ptr.vmem [resolvable:$true] %s44_s21 }
  0x26   :  { %p4706_p3 = scmp.lt.u32.totalorder %s4702_s24, %s5362_s3 }
  0x28   :  { %p4708_p4 = pnand %p4706_p3, %p4703_p2 }
  0x2a   :  { %4711 = shalt.err (!%p4708_p4)
}
  0x2b   :  { %s4712_s30 = scalar_lea.vmem %s45_s21, 1024  ;;  %p4717_p6 = scmp.lt.s32.totalorder %s45_s21, %s45_s21 }
  0x2c   :  { %p4713_p5 = scmp.ne.s32.totalorder %s45_s21, %s4712_s30  ;;  %p4718_p7 = scmp.lt.s32.totalorder %s4712_s30, %s4712_s30 }
  0x2e   :  { %p4719_p8 = por %p4718_p7, %p4717_p6 }
  0x30   :  { %p4720_p9 = pnand %p4719_p8, %p4713_p5 }
  0x32   :  { %4723 = shalt.err (!%p4720_p9)
}
  0x33   :  { %50 = dma.hbm_to_vmem [thread:$0]  %s5362_s3, 1024, %s45_s21, [#allocation7], %s4756_s1, %s4756_s1, %s4757_s17  }
  0x34   :  { %4746 = dma.done.wait [#allocation4], 512  }
  0x35   :  { %4747 = vsyncadd [#allocation4], 4294966784 }
  0x36   :  { %4748 = dma.done.wait [#allocation7], 3072  }
  0x37   :  { %4749 = vsyncadd [#allocation7], 4294964224  ;;  %v4759_v0 = vmov 0.0   ;;  %v67_v1 = vld [vmem:[#allocation6 + $0x8] sm:$0xff]  ;;  %v69_v2 = vld [vmem:[#allocation6 + $0x18] sm:$0xff]  ;;  %vm103_vm0 = vcmask 523264   ;;  %v93_v29 = vlaneseq }
  0x38   :  { %180 = vmatprep.mubr.f32.mxu0 %v4759_v0  ;;  %v66_v3 = vld [vmem:[#allocation6] sm:$0xff]  ;;  %v4166_v4 = vpack.c.bf16 %v69_v2, %v67_v1  ;;  %v68_v5 = vld [vmem:[#allocation6 + $0x10] sm:$0xff]  ;;  %v71_v6 = vld [vmem:[#allocation6 + $0x28] sm:$0xff]  ;;  %vm211_vm1 = vcmask 64512   ;;  %vm384_vm3 = vcmask 130048   ;;  %s4761_s8 = smov 56  }
  0x39   :  { %v73_v7 = vld [vmem:[#allocation6 + $0x38] sm:$0xff]  ;;  %v4168_v8 = vpack.c.bf16 %v68_v5, %v66_v3  ;;  %v70_v10 = vld [vmem:[#allocation6 + $0x20] sm:$0xff]  ;;  %v72_v11 = vld [vmem:[#allocation6 + $0x30] sm:$0xff]  ;;  %v94_v30 = vshrl.u32 %v93_v29, 7  ;;  %s4762_s9 = smov 120   ;;  %s4763_s10 = smov 48  }
  0x3a   :  { %v4170_v9 = vpack.c.bf16 %v73_v7, %v71_v6  ;;  %v75_v12 = vld [vmem:[#allocation6 + $0x48] sm:$0xff]  ;;  %4167 = vmatprep.subr.bf16.mxu0 %v4166_v4  ;;  %v77_v13 = vld [vmem:[#allocation6 + $0x58] sm:$0xff]  ;;  %v4172_v14 = vpack.c.bf16 %v72_v11, %v70_v10  ;;  %v74_v16 = vld [vmem:[#allocation6 + $0x40] sm:$0xff]  ;;  %s4764_s11 = smov 112   ;;  %s4765_s12 = smov 40   ;;  %vm1015_vm4 = vcmask 130112  }
  0x3b   :  { %4169 = vmatpush1.bf16.msra.mxu0 %v4168_v8  ;;  %v4174_v15 = vpack.c.bf16 %v77_v13, %v75_v12  ;;  %v76_v17 = vld [vmem:[#allocation6 + $0x50] sm:$0xff]  ;;  %v79_v18 = vld [vmem:[#allocation6 + $0x68] sm:$0xff]  ;;  %v81_v19 = vld [vmem:[#allocation6 + $0x78] sm:$0xff]  ;;  %v95_v31 = vsub.s32 0, %v94_v30  ;;  %v99_v34 = vsub.s32 1, %v94_v30  ;;  %s4766_s13 = smov 104  }
  0x3c   :  { %4171 = vmatprep.subr.bf16.mxu0 %v4170_v9  ;;  %v4176_v20 = vpack.c.bf16 %v76_v17, %v74_v16  ;;  %v4178_v21 = vpack.c.bf16 %v81_v19, %v79_v18  ;;  %v78_v22 = vld [vmem:[#allocation6 + $0x60] sm:$0xff]  ;;  %v80_v23 = vld [vmem:[#allocation6 + $0x70] sm:$0xff]  ;;  %v63_v26 = vld [vmem:[#allocation3 + $0x8] sm:$0xff]  ;;  %s4767_s14 = smov 32   ;;  %s4768_s15 = smov 96   ;;  %vm1436_vm5 = vcmask 195712  }
  0x3d   :  { %v4180_v24 = vpack.c.bf16 %v80_v23, %v78_v22  ;;  %v62_v25 = vld [vmem:[#allocation3] sm:$0xff]  ;;  %v64_v27 = vld [vmem:[#allocation3 + $0x10] sm:$0xff]  ;;  %v65_v28 = vld [vmem:[#allocation3 + $0x18] sm:$0xff]  ;;  %s4769_s16 = smov 24   ;;  %s4770_s18 = smov 88   ;;  %vm1857_vm6 = vcmask 261312  }
  0x3e   :  { %v90_v32 = vld [vmem:[%s5361_s2] sm:$0x3]  ;;  %s4760_s2 = smov 64   ;;  %vm4882_vm2 = vmpackc.low %vm211_vm1, %vm211_vm1  ;;  %s4771_s19 = smov 80   ;;  %vm2278_vm7 = vcmask 326912   ;;  %vm2699_vm8 = vcmask 392512  }
  0x3f   :  { %4173 = vmatpush1.bf16.msra.mxu0 %v4172_v14  ;;  %v96_v33 = vrot.slane %v90_v32, %v95_v31  ;;  %v100_v38 = vrot.slane %v90_v32, %v99_v34  ;;  %s4772_s20 = smov 72   ;;  %vm3120_vm9 = vcmask 458112   ;;  %vm3541_vm10 = vcmask 523712   ;;  %s4773_s22 = smov [#allocation9]  }
  0x40   :  { %4175 = vmatprep.subr.bf16.mxu0 %v4174_v15  ;;  %s3662_s23 = sshll.u32 %s4773_s22, 4  ;;  %s3663_s23 = int_to_ptr.vmem [resolvable:$true] %s3662_s23 }
  0x41   :  { %p4729_p11 = scmp.lt.s32.totalorder %s3663_s23, %s3663_s23 }
  0x43   :  { %4177 = vmatpush1.bf16.msra.mxu0 %v4176_v20 }
  0x44   :  { %4179 = vmatprep.subr.bf16.mxu0 %v4178_v21 }
  0x47   :  { %4181 = vmatpush1.bf16.msra.mxu0 %v4180_v24 }
  0x4a   :  { %3675 = vmatmul.mubr.msk.f32.vlgmr.msra.gmra.mrb[0].mxu0 %vm103_vm0, %v62_v25 }
  0x4b   :  { %186 = vmatprep.mubr.f32.mxu0 %v4759_v0 }
  0x4e   :  { %3676 = vmatmul.mubr.msk.f32.gmra.mrb[2].mxu0 %vm103_vm0, %v63_v26 }
  0x4f   :  { %192 = vmatprep.mubr.f32.mxu0 %v4759_v0 }
  0x52   :  { %3677 = vmatmul.mubr.msk.f32.gmra.mrb[4].mxu0 %vm103_vm0, %v64_v27 }
  0x53   :  { %198 = vmatprep.mubr.f32.mxu0 %v4759_v0 }
  0x56   :  { %3678 = vmatmul.mubr.msk.f32.gmra.mrb[6].mxu0 %vm103_vm0, %v65_v28 }
 0x11d   :  { %v182_v35 = vpop.f32.mrb[0].mxu0 }
 0x11e   :  { %v4854_v36 = vadd.f32 %v182_v35, %v96_v33  ;;  %v184_v37 = vpop.f32.mrb[1].mxu0 }
 0x11f   :  { %v185_v42 = vadd.f32 %v184_v37, %v100_v38 }
 0x120   :  { %3924 = vmatprep.mubr.msk.f32.mxu1 %vm211_vm1, %v4854_v36 }
 0x121   :  { %v188_v39 = vpop.f32.mrb[2].mxu0 }
 0x122   :  { %v4858_v40 = vadd.f32 %v188_v39, %v96_v33  ;;  %v190_v41 = vpop.f32.mrb[3].mxu0 }
 0x123   :  { %v191_v43 = vadd.f32 %v190_v41, %v100_v38 }
 0x124   :  { %v4862_v44 = vpack.i.bf16 %v4858_v40, %v4854_v36 }
 0x125   :  { %v194_v45 = vpop.f32.mrb[4].mxu0  ;;  %v4194_v46 = vpack.c.bf16 %v191_v43, %v185_v42  ;;  %v4864_v47 = vpack.i.bf16 %v191_v43, %v185_v42 }
 0x126   :  { %4381 = vrot.lane.b32.xlu0 %v4862_v44, %s4760_s2  ;;  %v196_v48 = vpop.f32.mrb[5].mxu0  ;;  %v4867_v49 = vadd.f32 %v194_v45, %v96_v33 }
 0x127   :  { %v197_v50 = vadd.f32 %v196_v48, %v100_v38 }
 0x129   :  { %v200_v51 = vpop.f32.mrb[6].mxu0 }
 0x12a   :  { %v4869_v52 = vadd.f32 %v200_v51, %v96_v33  ;;  %v202_v53 = vpop.f32.mrb[7].mxu0 }
 0x12b   :  { %v203_v54 = vadd.f32 %v202_v53, %v100_v38 }
 0x12c   :  { %v4873_v55 = vpack.i.bf16 %v4869_v52, %v4867_v49 }
 0x12d   :  { %v4875_v56 = vpack.c.bf16 %v203_v54, %v197_v50  ;;  %v4877_v57 = vpack.i.bf16 %v203_v54, %v197_v50 }
 0x12e   :  { %4386 = vrot.lane.b32.xlu0 %v4873_v55, %s4760_s2 }
 0x198   :  { %v4382_v58 = vpop.permute.xlu0 %4381 }
 0x199   :  { %v4384_v59 = vunpack.i.h.bf16 %v4382_v58  ;;  %v4383_v60 = vunpack.i.l.bf16 %v4382_v58 }
 0x19b   :  { %v4182_v62 = vpack.c.bf16 %v4384_v59, %v4383_v60 }
 0x19d   :  { %4184 = vmatprep.subr.msk.bf16.mxu1 %vm4882_vm2, %v4182_v62 }
 0x19e   :  { %4187 = vmatpush3.bf16.xpose.msk.msra.mxu1 %vm4882_vm2, %v4182_v62 }
 0x1a0   :  { %v4387_v63 = vpop.permute.xlu0 %4386 }
 0x1a1   :  { %v4389_v0 = vunpack.i.h.bf16 %v4387_v63  ;;  %v4388_v1 = vunpack.i.l.bf16 %v4387_v63 }
 0x1a3   :  { %v4188_v2 = vpack.c.bf16 %v4389_v0, %v4388_v1 }
 0x1a5   :  { %3925 = vmatmul.mubr.msk.f32.vlgmr.msra.gmra.mrb[0].mxu1 %vm211_vm1, %v4858_v40  ;;  %4190 = vmatprep.subr.msk.bf16.mxu1 %vm4882_vm2, %v4188_v2 }
 0x1a6   :  { %4193 = vmatpush3.bf16.xpose.msk.msra.mxu1 %vm4882_vm2, %v4188_v2  ;;  %3931 = vmatprep.mubr.msk.f32.mxu1 %vm211_vm1, %v4867_v49 }
 0x1a7   :  { %4195 = vmatprep.subr.bf16.mxu1 %v4194_v46 }
 0x1ad   :  { %3932 = vmatmul.mubr.msk.f32.vlgmr.msra.gmra.mrb[2].mxu1 %vm211_vm1, %v4869_v52 }
 0x1ae   :  { %4197 = vmatpush3.bf16.msra.mxu1 %v4194_v46 }
 0x1af   :  { %4199 = vmatprep.subr.bf16.mxu1 %v4875_v56 }
 0x278   :  { %v3926_v3 = vpop.f32.mrb[0].mxu1 }
 0x279   :  { %v286_v4 = vpop.f32.mrb[1].mxu1  ;;  %v388_v6 = vsel %vm384_vm3, %v3926_v3, -inf }
 0x27a   :  { %v385_v5 = vsel %vm384_vm3, %v286_v4, -inf }
 0x27b   :  { %386 = vmax.xlane.f32.xlu1 %v385_v5 }
 0x27f   :  { %389 = vmax.xlane.f32.xlu1 %v388_v6 }
 0x280   :  { %v3933_v7 = vpop.f32.mrb[2].mxu1 }
 0x281   :  { %v375_v8 = vpop.f32.mrb[3].mxu1  ;;  %v394_v9 = vsel %vm384_vm3, %v3933_v7, -inf }
 0x282   :  { %v391_v10 = vsel %vm384_vm3, %v375_v8, -inf }
 0x283   :  { %395 = vmax.xlane.f32.xlu1 %v394_v9  ;;  %392 = vmax.xlane.f32.xlu0 %v391_v10 }
 0x294   :  { %4391 = vrot.lane.b32.xlu1 %v4873_v55, %s4761_s8 }
 0x299   :  { %686 = vrot.lane.b32.xlu0 %v4867_v49, %s4762_s9 }
 0x308   :  { %v387_v11 = vpop.xlane.xlu1 %386 }
 0x309   :  { %v397_v12 = vsub.f32 %v286_v4, %v387_v11 }
 0x30b   :  { %v401_v15 = vmul.f32 1.442695, %v397_v12 }
 0x30c   :  { %v390_v13 = vpop.xlane.xlu1 %389 }
 0x30d   :  { %v398_v14 = vsub.f32 %v3926_v3, %v390_v13 }
 0x30f   :  { %v403_v16 = vmul.f32 1.442695, %v398_v14 }
 0x310   :  { %v396_v17 = vpop.xlane.xlu1 %395  ;;  %v393_v18 = vpop.xlane.xlu0 %392 }
 0x311   :  { %4530 = vpow2.f32 %v403_v16  ;;  %v400_v19 = vsub.f32 %v3933_v7, %v396_v17  ;;  %v399_v21 = vsub.f32 %v375_v8, %v393_v18 }
 0x312   :  { %4532 = vpow2.f32 %v401_v15 }
 0x313   :  { %v407_v20 = vmul.f32 1.442695, %v400_v19  ;;  %v405_v22 = vmul.f32 1.442695, %v399_v21 }
 0x314   :  { %v4392_v31 = vpop.permute.xlu1 %4391  ;;  %v687_v53 = vpop.permute.xlu0 %686 }
 0x315   :  { %4534 = vpow2.f32 %v407_v20  ;;  %v4394_v39 = vunpack.i.h.bf16 %v4392_v31  ;;  %v4393_v41 = vunpack.i.l.bf16 %v4392_v31 }
 0x316   :  { %4536 = vpow2.f32 %v405_v22 }
 0x317   :  { %v4208_v45 = vpack.c.bf16 %v4394_v39, %v4393_v41 }
 0x31b   :  { %v4531_v23 = vpop.eup %4530 }
 0x31c   :  { %v412_v24 = vsel %vm384_vm3, %v4531_v23, 0.0  ;;  %v4533_v25 = vpop.eup %4532 }
 0x31d   :  { %413 = vadd.xlane.f32.xlu1 %v412_v24  ;;  %v409_v26 = vsel %vm384_vm3, %v4533_v25, 0.0 }
 0x31f   :  { %v4535_v27 = vpop.eup %4534 }
 0x320   :  { %v418_v28 = vsel %vm384_vm3, %v4535_v27, 0.0  ;;  %v4537_v29 = vpop.eup %4536 }
 0x321   :  { %410 = vadd.xlane.f32.xlu1 %v409_v26  ;;  %v415_v30 = vsel %vm384_vm3, %v4537_v29, 0.0 }
 0x325   :  { %419 = vadd.xlane.f32.xlu1 %v418_v28 }
 0x329   :  { %416 = vadd.xlane.f32.xlu1 %v415_v30 }
 0x33a   :  { %688 = vrot.lane.b32.xlu1 %v4869_v52, %s4762_s9 }
 0x3aa   :  { %v414_v32 = vpop.xlane.xlu1 %413 }
 0x3ab   :  { %4538 = vrcp.f32 %v414_v32 }
 0x3ae   :  { %v411_v33 = vpop.xlane.xlu1 %410 }
 0x3af   :  { %4540 = vrcp.f32 %v411_v33 }
 0x3b2   :  { %v420_v34 = vpop.xlane.xlu1 %419 }
 0x3b3   :  { %4542 = vrcp.f32 %v420_v34 }
 0x3b5   :  { %v4539_v37 = vpop.eup %4538 }
 0x3b6   :  { %v417_v35 = vpop.xlane.xlu1 %416  ;;  %v426_v43 = vmul.f32 %v4539_v37, %v4531_v23 }
 0x3b7   :  { %4544 = vrcp.f32 %v417_v35 }
 0x3b9   :  { %v4541_v38 = vpop.eup %4540 }
 0x3ba   :  { %v425_v42 = vmul.f32 %v4541_v38, %v4533_v25  ;;  %v689_v54 = vpop.permute.xlu1 %688 }
 0x3bc   :  { %3938 = vmatprep.mubr.msk.f32.mxu1 %vm384_vm3, %v425_v42 }
 0x3bd   :  { %3939 = vmatmul.mubr.msk.f32.vlgmr.msra.gmra.mrb[4].mxu1 %vm384_vm3, %v426_v43  ;;  %v4543_v46 = vpop.eup %4542 }
 0x3be   :  { %4201 = vmatpush3.bf16.msra.mxu1 %v4875_v56  ;;  %v428_v51 = vmul.f32 %v4543_v46, %v4535_v27 }
 0x3bf   :  { %4210 = vmatprep.subr.msk.bf16.mxu1 %vm4882_vm2, %v4208_v45 }
 0x3c1   :  { %v4545_v48 = vpop.eup %4544 }
 0x3c2   :  { %v427_v50 = vmul.f32 %v4545_v48, %v4537_v29 }
 0x3c4   :  { %3945 = vmatprep.mubr.msk.f32.mxu1 %vm384_vm3, %v427_v50 }
 0x3c5   :  { %3946 = vmatmul.mubr.msk.f32.vlgmr.msra.gmra.mrb[6].mxu1 %vm384_vm3, %v428_v51 }
 0x3c6   :  { %3959 = vmatprep.mubr.msk.f32.mxu1 %vm211_vm1, %v687_v53 }
 0x3c7   :  { %4213 = vmatpush3.bf16.xpose.msk.msra.mxu1 %vm4882_vm2, %v4208_v45 }
 0x3ce   :  { %3960 = vmatmul.mubr.msk.f32.vlgmr.msra.gmra.mrb[8].mxu1 %vm211_vm1, %v689_v54 }
 0x490   :  { %v3940_v56 = vpop.f32.mrb[4].mxu1 }
 0x491   :  { %592 = vst.msk [vmem:[#allocation2 + $0x8] sm:$0xff] %vm211_vm1, %v3940_v56  ;;  %v501_v58 = vpop.f32.mrb[5].mxu1 }
 0x492   :  { %591 = vst.msk [vmem:[#allocation2] sm:$0xff] %vm211_vm1, %v501_v58 }
 0x498   :  { %v3947_v59 = vpop.f32.mrb[6].mxu1 }
 0x499   :  { %594 = vst.msk [vmem:[#allocation2 + $0x18] sm:$0xff] %vm211_vm1, %v3947_v59  ;;  %v582_v60 = vpop.f32.mrb[7].mxu1 }
 0x49a   :  { %593 = vst.msk [vmem:[#allocation2 + $0x10] sm:$0xff] %vm211_vm1, %v582_v60 }
 0x4a1   :  { %v3961_v62 = vpop.f32.mrb[8].mxu1 }
 0x4a2   :  { %v768_v63 = vpop.f32.mrb[9].mxu1  ;;  %v786_v0 = vsel %vm384_vm3, %v3961_v62, -inf }
 0x4a3   :  { %787 = vmax.xlane.f32.xlu0 %v786_v0  ;;  %v783_v1 = vsel %vm384_vm3, %v768_v63, -inf }
 0x4a4   :  { %784 = vmax.xlane.f32.xlu1 %v783_v1 }
 0x4b5   :  { %4401 = vrot.lane.b32.xlu1 %v4862_v44, %s4761_s8 }
 0x4b9   :  { %4396 = vrot.lane.b32.xlu0 %v4877_v57, %s4762_s9  ;;  %4406 = vrot.lane.b32.xlu1 %v4862_v44, %s4763_s10 }
 0x4bd   :  { %595 = vrot.lane.b32.xlu0 %v4854_v36, %s4762_s9  ;;  %597 = vrot.lane.b32.xlu1 %v4858_v40, %s4762_s9 }
 0x4c1   :  { %4411 = vrot.lane.b32.xlu0 %v4873_v55, %s4763_s10 }
 0x4c5   :  { %1022 = vrot.lane.b32.xlu0 %v4858_v40, %s4764_s11 }
 0x4c9   :  { %1113 = vrot.lane.b32.xlu0 %v4869_v52, %s4764_s11 }
 0x530   :  { %v788_v2 = vpop.xlane.xlu0 %787 }
 0x531   :  { %v792_v3 = vsub.f32 %v3961_v62, %v788_v2  ;;  %v785_v4 = vpop.xlane.xlu1 %784 }
 0x532   :  { %v791_v5 = vsub.f32 %v768_v63, %v785_v4 }
 0x533   :  { %v799_v6 = vmul.f32 1.442695, %v792_v3 }
 0x534   :  { %v797_v7 = vmul.f32 1.442695, %v791_v5  ;;  %v4397_v8 = vpop.permute.xlu0 %4396 }
 0x535   :  { %4546 = vpow2.f32 %v799_v6  ;;  %v4399_v9 = vunpack.i.h.bf16 %v4397_v8  ;;  %v4398_v10 = vunpack.i.l.bf16 %v4397_v8  ;;  %v4402_v11 = vpop.permute.xlu1 %4401 }
 0x536   :  { %v4404_v12 = vunpack.i.h.bf16 %v4402_v11  ;;  %v4403_v13 = vunpack.i.l.bf16 %v4402_v11  ;;  %4548 = vpow2.f32 %v797_v7 }
 0x537   :  { %v4218_v14 = vpack.c.bf16 %v4399_v9, %v4398_v10 }
 0x538   :  { %v4202_v15 = vpack.c.bf16 %v4404_v12, %v4403_v13  ;;  %v596_v16 = vpop.permute.xlu0 %595 }
 0x539   :  { %3952 = vmatprep.mubr.msk.f32.mxu0 %vm211_vm1, %v596_v16  ;;  %4219 = vmatprep.subr.bf16.mxu1 %v4218_v14  ;;  %v4407_v17 = vpop.permute.xlu1 %4406 }
 0x53a   :  { %v4409_v18 = vunpack.i.h.bf16 %v4407_v17  ;;  %v4408_v19 = vunpack.i.l.bf16 %v4407_v17  ;;  %4204 = vmatprep.subr.msk.bf16.mxu0 %vm4882_vm2, %v4202_v15  ;;  %4221 = vmatpush3.bf16.msra.mxu1 %v4218_v14 }
 0x53b   :  { %4207 = vmatpush3.bf16.xpose.msk.msra.mxu0 %vm4882_vm2, %v4202_v15 }
 0x53c   :  { %v4222_v20 = vpack.c.bf16 %v4409_v18, %v4408_v19  ;;  %v4412_v28 = vpop.permute.xlu0 %4411 }
 0x53d   :  { %v598_v24 = vpop.permute.xlu1 %597  ;;  %v4414_v31 = vunpack.i.h.bf16 %v4412_v28  ;;  %v4413_v32 = vunpack.i.l.bf16 %v4412_v28 }
 0x53e   :  { %4224 = vmatprep.subr.msk.bf16.mxu1 %vm4882_vm2, %v4222_v20 }
 0x53f   :  { %v4547_v21 = vpop.eup %4546  ;;  %v4228_v35 = vpack.c.bf16 %v4414_v31, %v4413_v32 }
 0x540   :  { %v810_v22 = vsel %vm384_vm3, %v4547_v21, 0.0  ;;  %v4549_v23 = vpop.eup %4548  ;;  %v1023_v38 = vpop.permute.xlu0 %1022 }
 0x541   :  { %811 = vadd.xlane.f32.xlu1 %v810_v22  ;;  %v807_v25 = vsel %vm384_vm3, %v4549_v23, 0.0 }
 0x542   :  { %3953 = vmatmul.mubr.msk.f32.vlgmr.msra.gmra.mrb[8].mxu0 %vm211_vm1, %v598_v24 }
 0x544   :  { %v1114_v41 = vpop.permute.xlu0 %1113 }
 0x545   :  { %808 = vadd.xlane.f32.xlu1 %v807_v25 }
 0x556   :  { %1020 = vrot.lane.b32.xlu1 %v4854_v36, %s4764_s11 }
 0x55a   :  { %1111 = vrot.lane.b32.xlu1 %v4867_v49, %s4764_s11 }
 0x5ce   :  { %v812_v26 = vpop.xlane.xlu1 %811 }
 0x5cf   :  { %4550 = vrcp.f32 %v812_v26 }
 0x5d2   :  { %v809_v27 = vpop.xlane.xlu1 %808 }
 0x5d3   :  { %4552 = vrcp.f32 %v809_v27 }
 0x5d6   :  { %v1021_v37 = vpop.permute.xlu1 %1020 }
 0x5d9   :  { %v4551_v29 = vpop.eup %4550 }
 0x5da   :  { %v820_v34 = vmul.f32 %v4551_v29, %v4547_v21  ;;  %v1112_v39 = vpop.permute.xlu1 %1111 }
 0x5dd   :  { %v4553_v30 = vpop.eup %4552 }
 0x5de   :  { %v819_v33 = vmul.f32 %v4553_v30, %v4549_v23 }
 0x5e0   :  { %3973 = vmatprep.mubr.msk.f32.mxu1 %vm384_vm3, %v819_v33 }
 0x5e1   :  { %3974 = vmatmul.mubr.msk.f32.vlgmr.msra.gmra.mrb[10].mxu1 %vm384_vm3, %v820_v34 }
 0x5e2   :  { %4227 = vmatpush3.bf16.xpose.msk.msra.mxu1 %vm4882_vm2, %v4222_v20  ;;  %3980 = vmatprep.mubr.msk.f32.mxu1 %vm211_vm1, %v1021_v37 }
 0x5e3   :  { %4230 = vmatprep.subr.msk.bf16.mxu1 %vm4882_vm2, %v4228_v35 }
 0x5e9   :  { %3981 = vmatmul.mubr.msk.f32.vlgmr.msra.gmra.mrb[12].mxu1 %vm211_vm1, %v1023_v38 }
 0x5ea   :  { %4233 = vmatpush3.bf16.xpose.msk.msra.mxu1 %vm4882_vm2, %v4228_v35  ;;  %3987 = vmatprep.mubr.msk.f32.mxu1 %vm211_vm1, %v1112_v39 }
 0x5f1   :  { %3988 = vmatmul.mubr.msk.f32.vlgmr.msra.gmra.mrb[14].mxu1 %vm211_vm1, %v1114_v41 }
 0x615   :  { %v3954_v42 = vpop.f32.mrb[8].mxu0 }
 0x616   :  { %v677_v43 = vpop.f32.mrb[9].mxu0  ;;  %v780_v45 = vsel %vm384_vm3, %v3954_v42, -inf }
 0x617   :  { %781 = vmax.xlane.f32.xlu0 %v780_v45  ;;  %v777_v46 = vsel %vm384_vm3, %v677_v43, -inf }
 0x618   :  { %778 = vmax.xlane.f32.xlu1 %v777_v46 }
 0x6a4   :  { %v782_v48 = vpop.xlane.xlu0 %781 }
 0x6a5   :  { %v779_v50 = vpop.xlane.xlu1 %778  ;;  %v790_v51 = vsub.f32 %v3954_v42, %v782_v48 }
 0x6a6   :  { %v789_v54 = vsub.f32 %v677_v43, %v779_v50 }
 0x6a7   :  { %v795_v58 = vmul.f32 1.442695, %v790_v51 }
 0x6a8   :  { %v793_v59 = vmul.f32 1.442695, %v789_v54 }
 0x6a9   :  { %4554 = vpow2.f32 %v795_v58 }
 0x6aa   :  { %4556 = vpow2.f32 %v793_v59 }
 0x6b3   :  { %v4983_v4 = vpop.eup %4554 }
 0x6b4   :  { %v4976_v53 = vpop.f32.mrb[10].mxu1  ;;  %v4986_v6 = vpop.eup %4556  ;;  %v804_v7 = vsel %vm384_vm3, %v4983_v4, 0.0 }
 0x6b5   :  { %v4978_v56 = vpop.f32.mrb[11].mxu1  ;;  %v801_v8 = vsel %vm384_vm3, %v4986_v6, 0.0 }
 0x6bc   :  { %v3982_v60 = vpop.f32.mrb[12].mxu1 }
 0x6bd   :  { %v1102_v62 = vpop.f32.mrb[13].mxu1  ;;  %v1205_v63 = vsel %vm384_vm3, %v3982_v60, -inf }
 0x6be   :  { %1206 = vmax.xlane.f32.xlu1 %v1205_v63  ;;  %v1202_v0 = vsel %vm384_vm3, %v1102_v62, -inf }
 0x6bf   :  { %1203 = vmax.xlane.f32.xlu0 %v1202_v0 }
 0x6c4   :  { %v3989_v1 = vpop.f32.mrb[14].mxu1 }
 0x6c5   :  { %v1193_v2 = vpop.f32.mrb[15].mxu1  ;;  %v1211_v3 = vsel %vm384_vm3, %v3989_v1, -inf }
 0x6c6   :  { %1212 = vmax.xlane.f32.xlu1 %v1211_v3  ;;  %v1208_v5 = vsel %vm384_vm3, %v1193_v2, -inf }
 0x6c7   :  { %1209 = vmax.xlane.f32.xlu0 %v1208_v5 }
 0x6ca   :  { %805 = vadd.xlane.f32.xlu1 %v804_v7 }
 0x6cb   :  { %802 = vadd.xlane.f32.xlu0 %v801_v8 }
 0x6db   :  { %4421 = vrot.lane.b32.xlu1 %v4864_v47, %s4764_s11 }
 0x6df   :  { %4426 = vrot.lane.b32.xlu1 %v4877_v57, %s4764_s11 }
 0x6e1   :  { %4416 = vrot.lane.b32.xlu0 %v4864_v47, %s4762_s9 }
 0x6e3   :  { %4436 = vrot.lane.b32.xlu1 %v4873_v55, %s4765_s12 }
 0x6e5   :  { %4431 = vrot.lane.b32.xlu0 %v4862_v44, %s4765_s12 }
 0x74b   :  { %v1207_v9 = vpop.xlane.xlu1 %1206 }
 0x74c   :  { %v1215_v10 = vsub.f32 %v3982_v60, %v1207_v9  ;;  %v1204_v11 = vpop.xlane.xlu0 %1203 }
 0x74d   :  { %v1214_v12 = vsub.f32 %v1102_v62, %v1204_v11 }
 0x74e   :  { %v1220_v13 = vmul.f32 1.442695, %v1215_v10 }
 0x74f   :  { %v1218_v14 = vmul.f32 1.442695, %v1214_v12 }
 0x750   :  { %4558 = vpow2.f32 %v1220_v13 }
 0x751   :  { %4560 = vpow2.f32 %v1218_v14 }
 0x753   :  { %v1213_v15 = vpop.xlane.xlu1 %1212 }
 0x754   :  { %v1217_v16 = vsub.f32 %v3989_v1, %v1213_v15  ;;  %v1210_v17 = vpop.xlane.xlu0 %1209 }
 0x755   :  { %v1216_v18 = vsub.f32 %v1193_v2, %v1210_v17 }
 0x756   :  { %v1224_v19 = vmul.f32 1.442695, %v1217_v16 }
 0x757   :  { %v1222_v20 = vmul.f32 1.442695, %v1216_v18  ;;  %v806_v21 = vpop.xlane.xlu1 %805 }
 0x758   :  { %4562 = vpow2.f32 %v1224_v19  ;;  %v803_v22 = vpop.xlane.xlu0 %802 }
 0x759   :  { %4564 = vpow2.f32 %v1222_v20 }
 0x75a   :  { %v5002_v23 = vpop.eup %4558  ;;  %4566 = vrcp.f32 %v806_v21 }
 0x75b   :  { %v4561_v24 = vpop.eup %4560  ;;  %4568 = vrcp.f32 %v803_v22  ;;  %v4422_v25 = vpop.permute.xlu1 %4421  ;;  %v1229_v26 = vsel %vm384_vm3, %v5002_v23, 0.0 }
 0x75c   :  { %v4417_v27 = vpop.permute.xlu0 %4416  ;;  %1230 = vadd.xlane.f32.xlu1 %v1229_v26  ;;  %v1226_v28 = vsel %vm384_vm3, %v4561_v24, 0.0  ;;  %v4424_v29 = vunpack.i.h.bf16 %v4422_v25  ;;  %v4423_v30 = vunpack.i.l.bf16 %v4422_v25 }
 0x75d   :  { %v4419_v31 = vunpack.i.h.bf16 %v4417_v27  ;;  %v4418_v32 = vunpack.i.l.bf16 %v4417_v27  ;;  %1227 = vadd.xlane.f32.xlu0 %v1226_v28 }
 0x75e   :  { %v4234_v38 = vpack.c.bf16 %v4424_v29, %v4423_v30 }
 0x75f   :  { %v4427_v33 = vpop.permute.xlu1 %4426  ;;  %v4214_v34 = vpack.c.bf16 %v4419_v31, %v4418_v32 }
 0x760   :  { %v4429_v35 = vunpack.i.h.bf16 %v4427_v33  ;;  %v4428_v37 = vunpack.i.l.bf16 %v4427_v33  ;;  %v4432_v41 = vpop.permute.xlu0 %4431 }
 0x761   :  { %4215 = vmatprep.subr.bf16.mxu0 %v4214_v34  ;;  %v4434_v59 = vunpack.i.h.bf16 %v4432_v41  ;;  %v4433_v60 = vunpack.i.l.bf16 %v4432_v41 }
 0x762   :  { %v4563_v39 = vpop.eup %4562  ;;  %4217 = vmatpush3.bf16.msra.mxu0 %v4214_v34  ;;  %v4238_v42 = vpack.c.bf16 %v4429_v35, %v4428_v37 }
 0x763   :  { %v4565_v43 = vpop.eup %4564  ;;  %v4437_v45 = vpop.permute.xlu1 %4436  ;;  %4235 = vmatprep.subr.bf16.mxu0 %v4234_v38  ;;  %v1235_v46 = vsel %vm384_vm3, %v4563_v39, 0.0  ;;  %v4242_v1 = vpack.c.bf16 %v4434_v59, %v4433_v60 }
 0x764   :  { %v4567_v48 = vpop.eup %4566  ;;  %v4439_v50 = vunpack.i.h.bf16 %v4437_v45  ;;  %v4438_v51 = vunpack.i.l.bf16 %v4437_v45  ;;  %1236 = vadd.xlane.f32.xlu1 %v1235_v46  ;;  %4239 = vmatprep.subr.bf16.mxu1 %v4238_v42  ;;  %v1232_v54 = vsel %vm384_vm3, %v4565_v43, 0.0 }
 0x765   :  { %v4569_v58 = vpop.eup %4568  ;;  %1233 = vadd.xlane.f32.xlu0 %v1232_v54  ;;  %4241 = vmatpush3.bf16.msra.mxu1 %v4238_v42  ;;  %v818_v0 = vmul.f32 %v4567_v48, %v4983_v4 }
 0x766   :  { %v4248_v62 = vpack.c.bf16 %v4439_v50, %v4438_v51  ;;  %v817_v63 = vmul.f32 %v4569_v58, %v4986_v6 }
 0x768   :  { %3966 = vmatprep.mubr.msk.f32.mxu0 %vm384_vm3, %v817_v63  ;;  %4250 = vmatprep.subr.msk.bf16.mxu1 %vm4882_vm2, %v4248_v62 }
 0x769   :  { %3967 = vmatmul.mubr.msk.f32.vlgmr.msra.gmra.mrb[10].mxu0 %vm384_vm3, %v818_v0 }
 0x76a   :  { %4237 = vmatpush3.bf16.msra.mxu0 %v4234_v38 }
 0x76b   :  { %4244 = vmatprep.subr.msk.bf16.mxu0 %vm4882_vm2, %v4242_v1 }
 0x775   :  { %1443 = vrot.lane.b32.xlu1 %v4858_v40, %s4766_s13 }
 0x779   :  { %1534 = vrot.lane.b32.xlu1 %v4869_v52, %s4766_s13 }
 0x77b   :  { %1441 = vrot.lane.b32.xlu0 %v4854_v36, %s4766_s13 }
 0x77f   :  { %1532 = vrot.lane.b32.xlu0 %v4867_v49, %s4766_s13 }
 0x7e9   :  { %v1231_v2 = vpop.xlane.xlu1 %1230 }
 0x7ea   :  { %4570 = vrcp.f32 %v1231_v2  ;;  %v1228_v3 = vpop.xlane.xlu0 %1227 }
 0x7eb   :  { %4572 = vrcp.f32 %v1228_v3 }
 0x7f1   :  { %v1237_v4 = vpop.xlane.xlu1 %1236 }
 0x7f2   :  { %4574 = vrcp.f32 %v1237_v4  ;;  %v1234_v5 = vpop.xlane.xlu0 %1233 }
 0x7f3   :  { %4576 = vrcp.f32 %v1234_v5 }
 0x7f4   :  { %v4571_v6 = vpop.eup %4570 }
 0x7f5   :  { %v4573_v7 = vpop.eup %4572  ;;  %v1243_v9 = vmul.f32 %v4571_v6, %v5002_v23  ;;  %v1444_v15 = vpop.permute.xlu1 %1443 }
 0x7f6   :  { %v1242_v8 = vmul.f32 %v4573_v7, %v4561_v24  ;;  %v1442_v10 = vpop.permute.xlu0 %1441 }
 0x7f8   :  { %3994 = vmatprep.mubr.msk.f32.mxu0 %vm384_vm3, %v1242_v8 }
 0x7f9   :  { %3995 = vmatmul.mubr.msk.f32.vlgmr.msra.gmra.mrb[12].mxu0 %vm384_vm3, %v1243_v9  ;;  %v1535_v17 = vpop.permute.xlu1 %1534 }
 0x7fa   :  { %4247 = vmatpush3.bf16.xpose.msk.msra.mxu0 %vm4882_vm2, %v4242_v1  ;;  %4008 = vmatprep.mubr.msk.f32.mxu0 %vm211_vm1, %v1442_v10  ;;  %v1533_v16 = vpop.permute.xlu0 %1532 }
 0x7fc   :  { %v4575_v11 = vpop.eup %4574 }
 0x7fd   :  { %v4577_v12 = vpop.eup %4576  ;;  %v1245_v14 = vmul.f32 %v4575_v11, %v4563_v39 }
 0x7fe   :  { %v1244_v13 = vmul.f32 %v4577_v12, %v4565_v43 }
 0x800   :  { %4001 = vmatprep.mubr.msk.f32.mxu1 %vm384_vm3, %v1244_v13 }
 0x801   :  { %4009 = vmatmul.mubr.msk.f32.vlgmr.msra.gmra.mrb[14].mxu0 %vm211_vm1, %v1444_v15  ;;  %4002 = vmatmul.mubr.msk.f32.vlgmr.msra.gmra.mrb[16].mxu1 %vm384_vm3, %v1245_v14 }
 0x802   :  { %4253 = vmatpush3.bf16.xpose.msk.msra.mxu1 %vm4882_vm2, %v4248_v62  ;;  %4015 = vmatprep.mubr.msk.f32.mxu1 %vm211_vm1, %v1533_v16 }
 0x809   :  { %4016 = vmatmul.mubr.msk.f32.vlgmr.msra.gmra.mrb[18].mxu1 %vm211_vm1, %v1535_v17 }
 0x83c   :  { %v5038_v18 = vpop.f32.mrb[10].mxu0 }
 0x83d   :  { %v5040_v19 = vpop.f32.mrb[11].mxu0 }
 0x8cc   :  { %v5042_v20 = vpop.f32.mrb[12].mxu0 }
 0x8cd   :  { %v5044_v21 = vpop.f32.mrb[13].mxu0 }
 0x8d4   :  { %v4010_v22 = vpop.f32.mrb[14].mxu0  ;;  %v5046_v23 = vpop.f32.mrb[16].mxu1 }
 0x8d5   :  { %v1523_v24 = vpop.f32.mrb[15].mxu0  ;;  %v5048_v25 = vpop.f32.mrb[17].mxu1  ;;  %v1626_v26 = vsel %vm384_vm3, %v4010_v22, -inf }
 0x8d6   :  { %1627 = vmax.xlane.f32.xlu1 %v1626_v26  ;;  %v1623_v27 = vsel %vm384_vm3, %v1523_v24, -inf }
 0x8d7   :  { %1624 = vmax.xlane.f32.xlu0 %v1623_v27 }
 0x8dc   :  { %v4017_v28 = vpop.f32.mrb[18].mxu1 }
 0x8dd   :  { %v1614_v29 = vpop.f32.mrb[19].mxu1  ;;  %v1632_v31 = vsel %vm384_vm3, %v4017_v28, -inf }
 0x8de   :  { %v1629_v30 = vsel %vm384_vm3, %v1614_v29, -inf }
 0x8df   :  { %1630 = vmax.xlane.f32.xlu0 %v1629_v30 }
 0x8e3   :  { %1633 = vmax.xlane.f32.xlu0 %v1632_v31 }
 0x8e7   :  { %4441 = vrot.lane.b32.xlu1 %v4864_v47, %s4766_s13 }
 0x8eb   :  { %4451 = vrot.lane.b32.xlu1 %v4862_v44, %s4767_s14 }
 0x8ef   :  { %4456 = vrot.lane.b32.xlu1 %v4873_v55, %s4767_s14 }
 0x8f9   :  { %4446 = vrot.lane.b32.xlu0 %v4877_v57, %s4766_s13 }
 0x963   :  { %v1628_v32 = vpop.xlane.xlu1 %1627 }
 0x964   :  { %v1636_v33 = vsub.f32 %v4010_v22, %v1628_v32  ;;  %v1625_v34 = vpop.xlane.xlu0 %1624 }
 0x965   :  { %v1635_v35 = vsub.f32 %v1523_v24, %v1625_v34 }
 0x966   :  { %v1641_v37 = vmul.f32 1.442695, %v1636_v33 }
 0x967   :  { %v1639_v38 = vmul.f32 1.442695, %v1635_v35  ;;  %v4442_v39 = vpop.permute.xlu1 %4441 }
 0x968   :  { %4578 = vpow2.f32 %v1641_v37  ;;  %v4444_v41 = vunpack.i.h.bf16 %v4442_v39  ;;  %v4443_v42 = vunpack.i.l.bf16 %v4442_v39 }
 0x969   :  { %4580 = vpow2.f32 %v1639_v38 }
 0x96a   :  { %v4254_v43 = vpack.c.bf16 %v4444_v41, %v4443_v42 }
 0x96b   :  { %v4452_v45 = vpop.permute.xlu1 %4451 }
 0x96c   :  { %v4454_v46 = vunpack.i.h.bf16 %v4452_v45  ;;  %v4453_v48 = vunpack.i.l.bf16 %v4452_v45  ;;  %4255 = vmatprep.subr.bf16.mxu0 %v4254_v43  ;;  %v1631_v50 = vpop.xlane.xlu0 %1630 }
 0x96d   :  { %4257 = vmatpush3.bf16.msra.mxu0 %v4254_v43  ;;  %v1637_v11 = vsub.f32 %v1614_v29, %v1631_v50 }
 0x96e   :  { %v4262_v51 = vpack.c.bf16 %v4454_v46, %v4453_v48 }
 0x96f   :  { %v4457_v58 = vpop.permute.xlu1 %4456  ;;  %v1643_v12 = vmul.f32 1.442695, %v1637_v11 }
 0x970   :  { %4264 = vmatprep.subr.msk.bf16.mxu0 %vm4882_vm2, %v4262_v51  ;;  %v1634_v54 = vpop.xlane.xlu0 %1633  ;;  %v4459_v1 = vunpack.i.h.bf16 %v4457_v58  ;;  %v4458_v4 = vunpack.i.l.bf16 %v4457_v58 }
 0x971   :  { %v1638_v59 = vsub.f32 %v4017_v28, %v1634_v54 }
 0x972   :  { %v4579_v60 = vpop.eup %4578  ;;  %v4268_v8 = vpack.c.bf16 %v4459_v1, %v4458_v4 }
 0x973   :  { %v4581_v62 = vpop.eup %4580  ;;  %v1645_v63 = vmul.f32 1.442695, %v1638_v59  ;;  %v1650_v0 = vsel %vm384_vm3, %v4579_v60, 0.0 }
 0x974   :  { %1651 = vadd.xlane.f32.xlu0 %v1650_v0  ;;  %v4447_v2 = vpop.permute.xlu0 %4446  ;;  %v1647_v3 = vsel %vm384_vm3, %v4581_v62, 0.0 }
 0x975   :  { %4582 = vpow2.f32 %v1645_v63  ;;  %v4449_v5 = vunpack.i.h.bf16 %v4447_v2  ;;  %v4448_v6 = vunpack.i.l.bf16 %v4447_v2  ;;  %1648 = vadd.xlane.f32.xlu1 %v1647_v3 }
 0x976   :  { %4584 = vpow2.f32 %v1643_v12 }
 0x977   :  { %v4258_v7 = vpack.c.bf16 %v4449_v5, %v4448_v6 }
 0x979   :  { %4259 = vmatprep.subr.bf16.mxu1 %v4258_v7 }
 0x97a   :  { %4261 = vmatpush3.bf16.msra.mxu1 %v4258_v7 }
 0x97b   :  { %4270 = vmatprep.subr.msk.bf16.mxu1 %vm4882_vm2, %v4268_v8 }
 0x97f   :  { %v4583_v9 = vpop.eup %4582 }
 0x980   :  { %v1656_v10 = vsel %vm384_vm3, %v4583_v9, 0.0  ;;  %v4585_v13 = vpop.eup %4584 }
 0x981   :  { %1657 = vadd.xlane.f32.xlu0 %v1656_v10  ;;  %v1653_v14 = vsel %vm384_vm3, %v4585_v13, 0.0 }
 0x986   :  { %1864 = vrot.lane.b32.xlu1 %v4858_v40, %s4768_s15 }
 0x997   :  { %1862 = vrot.lane.b32.xlu0 %v4854_v36, %s4768_s15 }
 0x99b   :  { %1953 = vrot.lane.b32.xlu0 %v4867_v49, %s4768_s15 }
 0x9aa   :  { %1654 = vadd.xlane.f32.xlu1 %v1653_v14 }
 0x9bb   :  { %1955 = vrot.lane.b32.xlu1 %v4869_v52, %s4768_s15 }
 0xa01   :  { %v1652_v15 = vpop.xlane.xlu0 %1651 }
 0xa02   :  { %4586 = vrcp.f32 %v1652_v15  ;;  %v1649_v16 = vpop.xlane.xlu1 %1648 }
 0xa03   :  { %4588 = vrcp.f32 %v1649_v16 }
 0xa06   :  { %v1865_v29 = vpop.permute.xlu1 %1864 }
 0xa0c   :  { %v4587_v17 = vpop.eup %4586 }
 0xa0d   :  { %v4589_v22 = vpop.eup %4588  ;;  %v1664_v27 = vmul.f32 %v4587_v17, %v4579_v60 }
 0xa0e   :  { %v1658_v24 = vpop.xlane.xlu0 %1657  ;;  %v1663_v26 = vmul.f32 %v4589_v22, %v4581_v62 }
 0xa0f   :  { %4590 = vrcp.f32 %v1658_v24 }
 0xa10   :  { %4022 = vmatprep.mubr.msk.f32.mxu0 %vm384_vm3, %v1663_v26 }
 0xa11   :  { %4023 = vmatmul.mubr.msk.f32.vlgmr.msra.gmra.mrb[16].mxu0 %vm384_vm3, %v1664_v27 }
 0xa12   :  { %4267 = vmatpush3.bf16.xpose.msk.msra.mxu0 %vm4882_vm2, %v4262_v51  ;;  %v1863_v28 = vpop.permute.xlu0 %1862 }
 0xa13   :  { %4036 = vmatprep.mubr.msk.f32.mxu0 %vm211_vm1, %v1863_v28 }
 0xa16   :  { %v1954_v35 = vpop.permute.xlu0 %1953 }
 0xa19   :  { %4037 = vmatmul.mubr.msk.f32.vlgmr.msra.gmra.mrb[18].mxu0 %vm211_vm1, %v1865_v29  ;;  %v4591_v31 = vpop.eup %4590 }
 0xa1a   :  { %v1666_v34 = vmul.f32 %v4591_v31, %v4583_v9 }
 0xa37   :  { %v1655_v30 = vpop.xlane.xlu1 %1654 }
 0xa38   :  { %4592 = vrcp.f32 %v1655_v30 }
 0xa3b   :  { %v1956_v37 = vpop.permute.xlu1 %1955 }
 0xa42   :  { %v4593_v32 = vpop.eup %4592 }
 0xa43   :  { %v1665_v33 = vmul.f32 %v4593_v32, %v4585_v13 }
 0xa45   :  { %4029 = vmatprep.mubr.msk.f32.mxu1 %vm384_vm3, %v1665_v33 }
 0xa46   :  { %4030 = vmatmul.mubr.msk.f32.vlgmr.msra.gmra.mrb[20].mxu1 %vm384_vm3, %v1666_v34 }
 0xa47   :  { %4273 = vmatpush3.bf16.xpose.msk.msra.mxu1 %vm4882_vm2, %v4268_v8  ;;  %4043 = vmatprep.mubr.msk.f32.mxu1 %vm211_vm1, %v1954_v35 }
 0xa4e   :  { %4044 = vmatmul.mubr.msk.f32.vlgmr.msra.gmra.mrb[22].mxu1 %vm211_vm1, %v1956_v37 }
 0xae4   :  { %v5090_v38 = vpop.f32.mrb[16].mxu0 }
 0xae5   :  { %v5092_v39 = vpop.f32.mrb[17].mxu0 }
 0xaec   :  { %v4038_v41 = vpop.f32.mrb[18].mxu0 }
 0xaed   :  { %v1944_v42 = vpop.f32.mrb[19].mxu0  ;;  %v2047_v43 = vsel %vm384_vm3, %v4038_v41, -inf }
 0xaee   :  { %2048 = vmax.xlane.f32.xlu1 %v2047_v43  ;;  %v2044_v45 = vsel %vm384_vm3, %v1944_v42, -inf }
 0xaef   :  { %2045 = vmax.xlane.f32.xlu0 %v2044_v45 }
 0xaff   :  { %4461 = vrot.lane.b32.xlu1 %v4864_v47, %s4768_s15 }
 0xb03   :  { %4471 = vrot.lane.b32.xlu1 %v4862_v44, %s4769_s16 }
 0xb07   :  { %4476 = vrot.lane.b32.xlu1 %v4873_v55, %s4769_s16 }
 0xb19   :  { %v5102_v46 = vpop.f32.mrb[20].mxu1 }
 0xb1a   :  { %v5104_v48 = vpop.f32.mrb[21].mxu1 }
 0xb21   :  { %v4045_v50 = vpop.f32.mrb[22].mxu1 }
 0xb22   :  { %v2035_v51 = vpop.f32.mrb[23].mxu1  ;;  %v2053_v58 = vsel %vm384_vm3, %v4045_v50, -inf }
 0xb23   :  { %v2050_v54 = vsel %vm384_vm3, %v2035_v51, -inf }
 0xb24   :  { %2051 = vmax.xlane.f32.xlu0 %v2050_v54 }
 0xb28   :  { %2054 = vmax.xlane.f32.xlu0 %v2053_v58 }
 0xb3e   :  { %4466 = vrot.lane.b32.xlu0 %v4877_v57, %s4768_s15 }
 0xb7b   :  { %v2049_v59 = vpop.xlane.xlu1 %2048 }
 0xb7c   :  { %v2057_v60 = vsub.f32 %v4038_v41, %v2049_v59  ;;  %v2046_v62 = vpop.xlane.xlu0 %2045 }
 0xb7d   :  { %v2056_v63 = vsub.f32 %v1944_v42, %v2046_v62 }
 0xb7e   :  { %v2062_v0 = vmul.f32 1.442695, %v2057_v60 }
 0xb7f   :  { %v2060_v1 = vmul.f32 1.442695, %v2056_v63  ;;  %v4462_v2 = vpop.permute.xlu1 %4461 }
 0xb80   :  { %4594 = vpow2.f32 %v2062_v0  ;;  %v4464_v3 = vunpack.i.h.bf16 %v4462_v2  ;;  %v4463_v4 = vunpack.i.l.bf16 %v4462_v2 }
 0xb81   :  { %4596 = vpow2.f32 %v2060_v1 }
 0xb82   :  { %v4274_v5 = vpack.c.bf16 %v4464_v3, %v4463_v4 }
 0xb83   :  { %v4472_v6 = vpop.permute.xlu1 %4471 }
 0xb84   :  { %v4474_v7 = vunpack.i.h.bf16 %v4472_v6  ;;  %v4473_v8 = vunpack.i.l.bf16 %v4472_v6  ;;  %4275 = vmatprep.subr.bf16.mxu0 %v4274_v5 }
 0xb85   :  { %4277 = vmatpush3.bf16.msra.mxu0 %v4274_v5 }
 0xb86   :  { %v4282_v9 = vpack.c.bf16 %v4474_v7, %v4473_v8 }
 0xb87   :  { %v4477_v22 = vpop.permute.xlu1 %4476 }
 0xb88   :  { %4284 = vmatprep.subr.msk.bf16.mxu0 %vm4882_vm2, %v4282_v9  ;;  %v4479_v27 = vunpack.i.h.bf16 %v4477_v22  ;;  %v4478_v29 = vunpack.i.l.bf16 %v4477_v22 }
 0xb8a   :  { %v4595_v10 = vpop.eup %4594  ;;  %v4288_v33 = vpack.c.bf16 %v4479_v27, %v4478_v29 }
 0xb8b   :  { %v4597_v11 = vpop.eup %4596  ;;  %v2071_v12 = vsel %vm384_vm3, %v4595_v10, 0.0 }
 0xb8c   :  { %2072 = vadd.xlane.f32.xlu0 %v2071_v12  ;;  %v2068_v13 = vsel %vm384_vm3, %v4597_v11, 0.0 }
 0xb8d   :  { %2069 = vadd.xlane.f32.xlu1 %v2068_v13 }
 0xb9e   :  { %2285 = vrot.lane.b32.xlu1 %v4858_v40, %s4770_s18 }
 0xbb1   :  { %v2052_v14 = vpop.xlane.xlu0 %2051 }
 0xbb2   :  { %v2058_v15 = vsub.f32 %v2035_v51, %v2052_v14 }
 0xbb4   :  { %v2064_v16 = vmul.f32 1.442695, %v2058_v15 }
 0xbb5   :  { %v2055_v17 = vpop.xlane.xlu0 %2054 }
 0xbb6   :  { %4598 = vpow2.f32 %v2064_v16  ;;  %v2059_v24 = vsub.f32 %v4045_v50, %v2055_v17 }
 0xbb8   :  { %v2066_v26 = vmul.f32 1.442695, %v2059_v24 }
 0xbb9   :  { %v4467_v28 = vpop.permute.xlu0 %4466 }
 0xbba   :  { %4600 = vpow2.f32 %v2066_v26  ;;  %v4469_v30 = vunpack.i.h.bf16 %v4467_v28  ;;  %v4468_v31 = vunpack.i.l.bf16 %v4467_v28 }
 0xbbc   :  { %v4278_v32 = vpack.c.bf16 %v4469_v30, %v4468_v31 }
 0xbbe   :  { %4279 = vmatprep.subr.bf16.mxu1 %v4278_v32 }
 0xbbf   :  { %4281 = vmatpush3.bf16.msra.mxu1 %v4278_v32 }
 0xbc0   :  { %v4599_v34 = vpop.eup %4598  ;;  %4290 = vmatprep.subr.msk.bf16.mxu1 %vm4882_vm2, %v4288_v33 }
 0xbc1   :  { %v2074_v35 = vsel %vm384_vm3, %v4599_v34, 0.0 }
 0xbc2   :  { %2075 = vadd.xlane.f32.xlu1 %v2074_v35 }
 0xbc4   :  { %v4601_v37 = vpop.eup %4600 }
 0xbc5   :  { %v2077_v41 = vsel %vm384_vm3, %v4601_v37, 0.0 }
 0xbc6   :  { %2078 = vadd.xlane.f32.xlu0 %v2077_v41 }
 0xbd3   :  { %2376 = vrot.lane.b32.xlu1 %v4869_v52, %s4770_s18 }
 0xbdc   :  { %2283 = vrot.lane.b32.xlu0 %v4854_v36, %s4770_s18 }
 0xbe0   :  { %2374 = vrot.lane.b32.xlu0 %v4867_v49, %s4770_s18 }
 0xc19   :  { %v2073_v42 = vpop.xlane.xlu0 %2072 }
 0xc1a   :  { %4602 = vrcp.f32 %v2073_v42  ;;  %v2070_v43 = vpop.xlane.xlu1 %2069 }
 0xc1b   :  { %4604 = vrcp.f32 %v2070_v43 }
 0xc1e   :  { %v2286_v58 = vpop.permute.xlu1 %2285 }
 0xc24   :  { %v4603_v45 = vpop.eup %4602 }
 0xc25   :  { %v4605_v50 = vpop.eup %4604  ;;  %v2085_v54 = vmul.f32 %v4603_v45, %v4595_v10 }
 0xc26   :  { %v2084_v51 = vmul.f32 %v4605_v50, %v4597_v11 }
 0xc28   :  { %4050 = vmatprep.mubr.msk.f32.mxu0 %vm384_vm3, %v2084_v51 }
 0xc29   :  { %4051 = vmatmul.mubr.msk.f32.vlgmr.msra.gmra.mrb[20].mxu0 %vm384_vm3, %v2085_v54 }
 0xc2a   :  { %4287 = vmatpush3.bf16.xpose.msk.msra.mxu0 %vm4882_vm2, %v4282_v9 }
 0xc4f   :  { %v2076_v59 = vpop.xlane.xlu1 %2075 }
 0xc50   :  { %4606 = vrcp.f32 %v2076_v59 }
 0xc53   :  { %v2079_v60 = vpop.xlane.xlu0 %2078  ;;  %v2377_v4 = vpop.permute.xlu1 %2376 }
 0xc54   :  { %4608 = vrcp.f32 %v2079_v60 }
 0xc57   :  { %v2284_v62 = vpop.permute.xlu0 %2283 }
 0xc58   :  { %4064 = vmatprep.mubr.msk.f32.mxu0 %vm211_vm1, %v2284_v62 }
 0xc59   :  { %4065 = vmatmul.mubr.msk.f32.vlgmr.msra.gmra.mrb[22].mxu0 %vm211_vm1, %v2286_v58 }
 0xc5a   :  { %v4607_v63 = vpop.eup %4606 }
 0xc5b   :  { %v2086_v0 = vmul.f32 %v4607_v63, %v4599_v34  ;;  %v2375_v3 = vpop.permute.xlu0 %2374 }
 0xc5d   :  { %4057 = vmatprep.mubr.msk.f32.mxu1 %vm384_vm3, %v2086_v0 }
 0xc5e   :  { %v4609_v1 = vpop.eup %4608 }
 0xc5f   :  { %v2087_v2 = vmul.f32 %v4609_v1, %v4601_v37 }
 0xc61   :  { %4058 = vmatmul.mubr.msk.f32.vlgmr.msra.gmra.mrb[24].mxu1 %vm384_vm3, %v2087_v2 }
 0xc62   :  { %4293 = vmatpush3.bf16.xpose.msk.msra.mxu1 %vm4882_vm2, %v4288_v33  ;;  %4071 = vmatprep.mubr.msk.f32.mxu1 %vm211_vm1, %v2375_v3 }
 0xc69   :  { %4072 = vmatmul.mubr.msk.f32.vlgmr.msra.gmra.mrb[26].mxu1 %vm211_vm1, %v2377_v4 }
 0xcfc   :  { %v5138_v5 = vpop.f32.mrb[20].mxu0 }
 0xcfd   :  { %v5140_v6 = vpop.f32.mrb[21].mxu0 }
 0xd2c   :  { %v4066_v7 = vpop.f32.mrb[22].mxu0 }
 0xd2d   :  { %v2365_v8 = vpop.f32.mrb[23].mxu0  ;;  %v2468_v9 = vsel %vm384_vm3, %v4066_v7, -inf }
 0xd2e   :  { %2469 = vmax.xlane.f32.xlu1 %v2468_v9  ;;  %v2465_v10 = vsel %vm384_vm3, %v2365_v8, -inf }
 0xd2f   :  { %2466 = vmax.xlane.f32.xlu0 %v2465_v10 }
 0xd34   :  { %v5144_v11 = vpop.f32.mrb[24].mxu1 }
 0xd35   :  { %v5146_v12 = vpop.f32.mrb[25].mxu1 }
 0xd3c   :  { %v4073_v13 = vpop.f32.mrb[26].mxu1 }
 0xd3d   :  { %v2456_v14 = vpop.f32.mrb[27].mxu1  ;;  %v2474_v16 = vsel %vm384_vm3, %v4073_v13, -inf }
 0xd3e   :  { %v2471_v15 = vsel %vm384_vm3, %v2456_v14, -inf }
 0xd3f   :  { %2472 = vmax.xlane.f32.xlu0 %v2471_v15  ;;  %4481 = vrot.lane.b32.xlu1 %v4864_v47, %s4770_s18 }
 0xd43   :  { %2475 = vmax.xlane.f32.xlu0 %v2474_v16  ;;  %4491 = vrot.lane.b32.xlu1 %v4862_v44, %s4754_s29 }
 0xd47   :  { %4496 = vrot.lane.b32.xlu1 %v4873_v55, %s4754_s29 }
 0xd59   :  { %4486 = vrot.lane.b32.xlu0 %v4877_v57, %s4770_s18 }
 0xdbb   :  { %v2470_v17 = vpop.xlane.xlu1 %2469 }
 0xdbc   :  { %v2478_v22 = vsub.f32 %v4066_v7, %v2470_v17  ;;  %v2467_v24 = vpop.xlane.xlu0 %2466 }
 0xdbd   :  { %v2477_v26 = vsub.f32 %v2365_v8, %v2467_v24 }
 0xdbe   :  { %v2483_v27 = vmul.f32 1.442695, %v2478_v22 }
 0xdbf   :  { %v2481_v28 = vmul.f32 1.442695, %v2477_v26  ;;  %v4482_v29 = vpop.permute.xlu1 %4481 }
 0xdc0   :  { %4610 = vpow2.f32 %v2483_v27  ;;  %v4484_v30 = vunpack.i.h.bf16 %v4482_v29  ;;  %v4483_v31 = vunpack.i.l.bf16 %v4482_v29 }
 0xdc1   :  { %4612 = vpow2.f32 %v2481_v28 }
 0xdc2   :  { %v4294_v32 = vpack.c.bf16 %v4484_v30, %v4483_v31 }
 0xdc3   :  { %v4492_v33 = vpop.permute.xlu1 %4491 }
 0xdc4   :  { %v4494_v34 = vunpack.i.h.bf16 %v4492_v33  ;;  %v4493_v35 = vunpack.i.l.bf16 %v4492_v33  ;;  %4295 = vmatprep.subr.bf16.mxu0 %v4294_v32 }
 0xdc5   :  { %4297 = vmatpush3.bf16.msra.mxu0 %v4294_v32 }
 0xdc6   :  { %v4302_v37 = vpack.c.bf16 %v4494_v34, %v4493_v35 }
 0xdc7   :  { %v4497_v54 = vpop.permute.xlu1 %4496 }
 0xdc8   :  { %4304 = vmatprep.subr.msk.bf16.mxu0 %vm4882_vm2, %v4302_v37  ;;  %v4499_v60 = vunpack.i.h.bf16 %v4497_v54  ;;  %v4498_v63 = vunpack.i.l.bf16 %v4497_v54 }
 0xdca   :  { %v4611_v41 = vpop.eup %4610  ;;  %v4308_v3 = vpack.c.bf16 %v4499_v60, %v4498_v63 }
 0xdcb   :  { %v4613_v42 = vpop.eup %4612  ;;  %v2492_v43 = vsel %vm384_vm3, %v4611_v41, 0.0 }
 0xdcc   :  { %v2473_v45 = vpop.xlane.xlu0 %2472  ;;  %2493 = vadd.xlane.f32.xlu0 %v2492_v43  ;;  %v2489_v50 = vsel %vm384_vm3, %v4613_v42, 0.0 }
 0xdcd   :  { %2490 = vadd.xlane.f32.xlu1 %v2489_v50  ;;  %v2479_v8 = vsub.f32 %v2456_v14, %v2473_v45 }
 0xdcf   :  { %v2485_v9 = vmul.f32 1.442695, %v2479_v8 }
 0xdd0   :  { %v2476_v51 = vpop.xlane.xlu0 %2475 }
 0xdd1   :  { %v2480_v58 = vsub.f32 %v4073_v13, %v2476_v51 }
 0xdd3   :  { %v2487_v59 = vmul.f32 1.442695, %v2480_v58 }
 0xdd4   :  { %v4487_v62 = vpop.permute.xlu0 %4486 }
 0xdd5   :  { %4614 = vpow2.f32 %v2487_v59  ;;  %v4489_v0 = vunpack.i.h.bf16 %v4487_v62  ;;  %v4488_v1 = vunpack.i.l.bf16 %v4487_v62 }
 0xdd6   :  { %4616 = vpow2.f32 %v2485_v9 }
 0xdd7   :  { %v4298_v2 = vpack.c.bf16 %v4489_v0, %v4488_v1 }
 0xdd9   :  { %4299 = vmatprep.subr.bf16.mxu1 %v4298_v2 }
 0xdda   :  { %4301 = vmatpush3.bf16.msra.mxu1 %v4298_v2 }
 0xddb   :  { %4310 = vmatprep.subr.msk.bf16.mxu1 %vm4882_vm2, %v4308_v3 }
 0xdde   :  { %2706 = vrot.lane.b32.xlu1 %v4858_v40, %s4771_s19 }
 0xddf   :  { %v4615_v4 = vpop.eup %4614 }
 0xde0   :  { %v2498_v7 = vsel %vm384_vm3, %v4615_v4, 0.0  ;;  %v4617_v10 = vpop.eup %4616 }
 0xde1   :  { %2499 = vadd.xlane.f32.xlu0 %v2498_v7  ;;  %v2495_v13 = vsel %vm384_vm3, %v4617_v10, 0.0 }
 0xdf7   :  { %2704 = vrot.lane.b32.xlu0 %v4854_v36, %s4771_s19 }
 0xdfb   :  { %2795 = vrot.lane.b32.xlu0 %v4867_v49, %s4771_s19 }
 0xe02   :  { %2496 = vadd.xlane.f32.xlu1 %v2495_v13 }
 0xe13   :  { %2797 = vrot.lane.b32.xlu1 %v4869_v52, %s4771_s19 }
 0xe59   :  { %v2494_v15 = vpop.xlane.xlu0 %2493 }
 0xe5a   :  { %4618 = vrcp.f32 %v2494_v15  ;;  %v2491_v16 = vpop.xlane.xlu1 %2490 }
 0xe5b   :  { %4620 = vrcp.f32 %v2491_v16 }
 0xe5e   :  { %v2707_v28 = vpop.permute.xlu1 %2706 }
 0xe64   :  { %v4619_v14 = vpop.eup %4618 }
 0xe65   :  { %v4621_v17 = vpop.eup %4620  ;;  %v2506_v24 = vmul.f32 %v4619_v14, %v4611_v41 }
 0xe66   :  { %v2505_v22 = vmul.f32 %v4621_v17, %v4613_v42 }
 0xe68   :  { %4078 = vmatprep.mubr.msk.f32.mxu0 %vm384_vm3, %v2505_v22 }
 0xe69   :  { %4079 = vmatmul.mubr.msk.f32.vlgmr.msra.gmra.mrb[24].mxu0 %vm384_vm3, %v2506_v24 }
 0xe6a   :  { %4307 = vmatpush3.bf16.xpose.msk.msra.mxu0 %vm4882_vm2, %v4302_v37 }
 0xe6e   :  { %v2500_v26 = vpop.xlane.xlu0 %2499 }
 0xe6f   :  { %4622 = vrcp.f32 %v2500_v26 }
 0xe72   :  { %v2705_v27 = vpop.permute.xlu0 %2704 }
 0xe73   :  { %4092 = vmatprep.mubr.msk.f32.mxu0 %vm211_vm1, %v2705_v27 }
 0xe74   :  { %4093 = vmatmul.mubr.msk.f32.vlgmr.msra.gmra.mrb[26].mxu0 %vm211_vm1, %v2707_v28 }
 0xe76   :  { %v2796_v34 = vpop.permute.xlu0 %2795 }
 0xe79   :  { %v4623_v30 = vpop.eup %4622 }
 0xe7a   :  { %v2508_v33 = vmul.f32 %v4623_v30, %v4615_v4 }
 0xe8f   :  { %v2497_v29 = vpop.xlane.xlu1 %2496 }
 0xe90   :  { %4624 = vrcp.f32 %v2497_v29 }
 0xe93   :  { %v2798_v35 = vpop.permute.xlu1 %2797 }
 0xe9a   :  { %v4625_v31 = vpop.eup %4624 }
 0xe9b   :  { %v2507_v32 = vmul.f32 %v4625_v31, %v4617_v10 }
 0xe9d   :  { %4085 = vmatprep.mubr.msk.f32.mxu1 %vm384_vm3, %v2507_v32 }
 0xe9e   :  { %4086 = vmatmul.mubr.msk.f32.vlgmr.msra.gmra.mrb[28].mxu1 %vm384_vm3, %v2508_v33 }
 0xe9f   :  { %4313 = vmatpush3.bf16.xpose.msk.msra.mxu1 %vm4882_vm2, %v4308_v3  ;;  %4099 = vmatprep.mubr.msk.f32.mxu1 %vm211_vm1, %v2796_v34 }
 0xea6   :  { %4100 = vmatmul.mubr.msk.f32.vlgmr.msra.gmra.mrb[30].mxu1 %vm211_vm1, %v2798_v35 }
 0xf3c   :  { %v5186_v37 = vpop.f32.mrb[24].mxu0 }
 0xf3d   :  { %v5188_v41 = vpop.f32.mrb[25].mxu0 }
 0xf47   :  { %v4094_v42 = vpop.f32.mrb[26].mxu0 }
 0xf48   :  { %v2786_v43 = vpop.f32.mrb[27].mxu0  ;;  %v2889_v45 = vsel %vm384_vm3, %v4094_v42, -inf }
 0xf49   :  { %2890 = vmax.xlane.f32.xlu1 %v2889_v45  ;;  %v2886_v50 = vsel %vm384_vm3, %v2786_v43, -inf }
 0xf4a   :  { %2887 = vmax.xlane.f32.xlu0 %v2886_v50 }
 0xf5a   :  { %4501 = vrot.lane.b32.xlu1 %v4864_v47, %s4771_s19 }
 0xf5e   :  { %4511 = vrot.lane.b32.xlu1 %v4862_v44, %s4757_s17 }
 0xf62   :  { %4516 = vrot.lane.b32.xlu1 %v4873_v55, %s4757_s17 }
 0xf71   :  { %v5198_v51 = vpop.f32.mrb[28].mxu1 }
 0xf72   :  { %v5200_v54 = vpop.f32.mrb[29].mxu1 }
 0xf79   :  { %v4101_v58 = vpop.f32.mrb[30].mxu1 }
 0xf7a   :  { %v2877_v59 = vpop.f32.mrb[31].mxu1  ;;  %v2895_v62 = vsel %vm384_vm3, %v4101_v58, -inf }
 0xf7b   :  { %v2892_v60 = vsel %vm384_vm3, %v2877_v59, -inf }
 0xf7c   :  { %2893 = vmax.xlane.f32.xlu0 %v2892_v60 }
 0xf80   :  { %2896 = vmax.xlane.f32.xlu0 %v2895_v62 }
 0xf96   :  { %4506 = vrot.lane.b32.xlu0 %v4877_v57, %s4771_s19 }
 0xfd6   :  { %v2891_v63 = vpop.xlane.xlu1 %2890 }
 0xfd7   :  { %v2899_v44 = vsub.f32 %v4094_v42, %v2891_v63  ;;  %v2888_v0 = vpop.xlane.xlu0 %2887 }
 0xfd8   :  { %v2898_v1 = vsub.f32 %v2786_v43, %v2888_v0 }
 0xfd9   :  { %v2904_v55 = vmul.f32 1.442695, %v2899_v44 }
 0xfda   :  { %v2902_v2 = vmul.f32 1.442695, %v2898_v1  ;;  %v4502_v3 = vpop.permute.xlu1 %4501 }
 0xfdb   :  { %4626 = vpow2.f32 %v2904_v55  ;;  %v4504_v4 = vunpack.i.h.bf16 %v4502_v3  ;;  %v4503_v7 = vunpack.i.l.bf16 %v4502_v3 }
 0xfdc   :  { %4628 = vpow2.f32 %v2902_v2 }
 0xfdd   :  { %v4314_v8 = vpack.c.bf16 %v4504_v4, %v4503_v7 }
 0xfde   :  { %v4512_v9 = vpop.permute.xlu1 %4511 }
 0xfdf   :  { %v4514_v10 = vunpack.i.h.bf16 %v4512_v9  ;;  %v4513_v13 = vunpack.i.l.bf16 %v4512_v9  ;;  %4315 = vmatprep.subr.bf16.mxu0 %v4314_v8 }
 0xfe0   :  { %4317 = vmatpush3.bf16.msra.mxu0 %v4314_v8 }
 0xfe1   :  { %v4322_v15 = vpack.c.bf16 %v4514_v10, %v4513_v13 }
 0xfe2   :  { %v4517_v29 = vpop.permute.xlu1 %4516 }
 0xfe3   :  { %4324 = vmatprep.subr.msk.bf16.mxu0 %vm4882_vm2, %v4322_v15  ;;  %v4519_v32 = vunpack.i.h.bf16 %v4517_v29  ;;  %v4518_v34 = vunpack.i.l.bf16 %v4517_v29 }
 0xfe5   :  { %v4627_v16 = vpop.eup %4626  ;;  %v4328_v45 = vpack.c.bf16 %v4519_v32, %v4518_v34 }
 0xfe6   :  { %v4629_v14 = vpop.eup %4628  ;;  %v2913_v17 = vsel %vm384_vm3, %v4627_v16, 0.0 }
 0xfe7   :  { %2914 = vadd.xlane.f32.xlu0 %v2913_v17  ;;  %v2910_v22 = vsel %vm384_vm3, %v4629_v14, 0.0 }
 0xfe8   :  { %2911 = vadd.xlane.f32.xlu1 %v2910_v22 }
 0xff9   :  { %3127 = vrot.lane.b32.xlu1 %v4858_v40, %s4772_s20 }
0x1009   :  { %v2894_v24 = vpop.xlane.xlu0 %2893 }
0x100a   :  { %v2900_v26 = vsub.f32 %v2877_v59, %v2894_v24 }
0x100c   :  { %v2906_v27 = vmul.f32 1.442695, %v2900_v26 }
0x100d   :  { %v2897_v28 = vpop.xlane.xlu0 %2896 }
0x100e   :  { %v2901_v30 = vsub.f32 %v4101_v58, %v2897_v28  ;;  %4630 = vpow2.f32 %v2906_v27 }
0x1010   :  { %v2908_v31 = vmul.f32 1.442695, %v2901_v30 }
0x1011   :  { %v4507_v33 = vpop.permute.xlu0 %4506 }
0x1012   :  { %4632 = vpow2.f32 %v2908_v31  ;;  %v4509_v35 = vunpack.i.h.bf16 %v4507_v33  ;;  %v4508_v42 = vunpack.i.l.bf16 %v4507_v33 }
0x1014   :  { %v4318_v43 = vpack.c.bf16 %v4509_v35, %v4508_v42 }
0x1016   :  { %4319 = vmatprep.subr.bf16.mxu1 %v4318_v43 }
0x1017   :  { %4321 = vmatpush3.bf16.msra.mxu1 %v4318_v43 }
0x1018   :  { %4330 = vmatprep.subr.msk.bf16.mxu1 %vm4882_vm2, %v4328_v45  ;;  %v4631_v40 = vpop.eup %4630 }
0x1019   :  { %v2916_v59 = vsel %vm384_vm3, %v4631_v40, 0.0 }
0x101c   :  { %v4633_v50 = vpop.eup %4632 }
0x101d   :  { %2917 = vadd.xlane.f32.xlu1 %v2916_v59  ;;  %v2919_v58 = vsel %vm384_vm3, %v4633_v50, 0.0 }
0x101e   :  { %2920 = vadd.xlane.f32.xlu0 %v2919_v58 }
0x102e   :  { %3218 = vrot.lane.b32.xlu1 %v4869_v52, %s4772_s20 }
0x1034   :  { %3125 = vrot.lane.b32.xlu0 %v4854_v36, %s4772_s20 }
0x1038   :  { %3216 = vrot.lane.b32.xlu0 %v4867_v49, %s4772_s20 }
0x1074   :  { %v2915_v60 = vpop.xlane.xlu0 %2914 }
0x1075   :  { %4634 = vrcp.f32 %v2915_v60  ;;  %v2912_v62 = vpop.xlane.xlu1 %2911 }
0x1076   :  { %4636 = vrcp.f32 %v2912_v62 }
0x1079   :  { %v3128_v52 = vpop.permute.xlu1 %3127 }
0x107f   :  { %v4635_v63 = vpop.eup %4634 }
0x1080   :  { %v4637_v44 = vpop.eup %4636  ;;  %v2927_v1 = vmul.f32 %v4635_v63, %v4627_v16 }
0x1081   :  { %v2926_v0 = vmul.f32 %v4637_v44, %v4629_v14 }
0x1083   :  { %4106 = vmatprep.mubr.msk.f32.mxu0 %vm384_vm3, %v2926_v0 }
0x1084   :  { %4107 = vmatmul.mubr.msk.f32.vlgmr.msra.gmra.mrb[28].mxu0 %vm384_vm3, %v2927_v1 }
0x1085   :  { %4327 = vmatpush3.bf16.xpose.msk.msra.mxu0 %vm4882_vm2, %v4322_v15 }
0x10aa   :  { %v2918_v36 = vpop.xlane.xlu1 %2917 }
0x10ab   :  { %4638 = vrcp.f32 %v2918_v36  ;;  %v2921_v55 = vpop.xlane.xlu0 %2920 }
0x10ac   :  { %4640 = vrcp.f32 %v2921_v55 }
0x10ae   :  { %v3219_v9 = vpop.permute.xlu1 %3218 }
0x10af   :  { %v3126_v49 = vpop.permute.xlu0 %3125 }
0x10b0   :  { %4120 = vmatprep.mubr.msk.f32.mxu0 %vm211_vm1, %v3126_v49 }
0x10b1   :  { %4121 = vmatmul.mubr.msk.f32.vlgmr.msra.gmra.mrb[30].mxu0 %vm211_vm1, %v3128_v52 }
0x10b3   :  { %v3217_v8 = vpop.permute.xlu0 %3216 }
0x10b5   :  { %v4639_v2 = vpop.eup %4638 }
0x10b6   :  { %v4641_v3 = vpop.eup %4640  ;;  %v2928_v4 = vmul.f32 %v4639_v2, %v4631_v40 }
0x10b7   :  { %v2929_v7 = vmul.f32 %v4641_v3, %v4633_v50 }
0x10b8   :  { %4113 = vmatprep.mubr.msk.f32.mxu1 %vm384_vm3, %v2928_v4 }
0x10b9   :  { %4114 = vmatmul.mubr.msk.f32.vlgmr.msra.gmra.mrb[32].mxu1 %vm384_vm3, %v2929_v7 }
0x10ba   :  { %4333 = vmatpush3.bf16.xpose.msk.msra.mxu1 %vm4882_vm2, %v4328_v45  ;;  %4127 = vmatprep.mubr.msk.f32.mxu1 %vm211_vm1, %v3217_v8 }
0x10c1   :  { %4128 = vmatmul.mubr.msk.f32.vlgmr.msra.gmra.mrb[34].mxu1 %vm211_vm1, %v3219_v9 }
0x1157   :  { %v4108_v10 = vpop.f32.mrb[28].mxu0 }
0x1158   :  { %v3008_v13 = vpop.f32.mrb[29].mxu0 }
0x1184   :  { %v4122_v15 = vpop.f32.mrb[30].mxu0 }
0x1185   :  { %v3207_v16 = vpop.f32.mrb[31].mxu0  ;;  %v3310_v14 = vsel %vm384_vm3, %v4122_v15, -inf }
0x1186   :  { %3311 = vmax.xlane.f32.xlu1 %v3310_v14  ;;  %v3307_v17 = vsel %vm384_vm3, %v3207_v16, -inf }
0x1187   :  { %3308 = vmax.xlane.f32.xlu0 %v3307_v17 }
0x118c   :  { %v5236_v22 = vpop.f32.mrb[32].mxu1 }
0x118d   :  { %v3095_v24 = vpop.f32.mrb[33].mxu1 }
0x1194   :  { %v4129_v61 = vpop.f32.mrb[34].mxu1 }
0x1195   :  { %v3298_v26 = vpop.f32.mrb[35].mxu1  ;;  %v3316_v28 = vsel %vm384_vm3, %v4129_v61, -inf }
0x1196   :  { %v3313_v27 = vsel %vm384_vm3, %v3298_v26, -inf }
0x1197   :  { %3314 = vmax.xlane.f32.xlu0 %v3313_v27 }
0x119b   :  { %3317 = vmax.xlane.f32.xlu0 %v3316_v28 }
0x1213   :  { %v3312_v29 = vpop.xlane.xlu1 %3311 }
0x1214   :  { %v3320_v30 = vsub.f32 %v4122_v15, %v3312_v29  ;;  %v3309_v31 = vpop.xlane.xlu0 %3308  ;;  %v82_v29 = vld [vmem:[#allocation8] sm:$0xff] }
0x1215   :  { %v3319_v32 = vsub.f32 %v3207_v16, %v3309_v31  ;;  %v84_v31 = vld [vmem:[#allocation8 + $0x10] sm:$0xff] }
0x1216   :  { %v3325_v33 = vmul.f32 1.442695, %v3320_v30  ;;  %v83_v30 = vld [vmem:[#allocation8 + $0x8] sm:$0xff] }
0x1217   :  { %v3323_v34 = vmul.f32 1.442695, %v3319_v32  ;;  %v4342_v32 = vpack.c.bf16 %v83_v30, %v82_v29 }
0x1218   :  { %4642 = vpow2.f32 %v3325_v33  ;;  %v85_v33 = vld [vmem:[#allocation8 + $0x18] sm:$0xff] }
0x1219   :  { %4644 = vpow2.f32 %v3323_v34  ;;  %v4346_v34 = vpack.c.bf16 %v85_v33, %v84_v31 }
0x1222   :  { %v5240_v35 = vpop.eup %4642 }
0x1223   :  { %v4645_v42 = vpop.eup %4644  ;;  %v3334_v43 = vsel %vm384_vm3, %v5240_v35, 0.0 }
0x1224   :  { %v3315_v45 = vpop.xlane.xlu0 %3314  ;;  %3335 = vadd.xlane.f32.xlu0 %v3334_v43  ;;  %v3331_v40 = vsel %vm384_vm3, %v4645_v42, 0.0 }
0x1225   :  { %v3321_v50 = vsub.f32 %v3298_v26, %v3315_v45  ;;  %3332 = vadd.xlane.f32.xlu1 %v3331_v40  ;;  %v88_v45 = vld [vmem:[#allocation8 + $0x30] sm:$0xff]  ;;  %v89_v40 = vld [vmem:[#allocation8 + $0x38] sm:$0xff] }
0x1227   :  { %v3327_v59 = vmul.f32 1.442695, %v3321_v50  ;;  %v4354_v50 = vpack.c.bf16 %v89_v40, %v88_v45 }
0x1228   :  { %v3318_v58 = vpop.xlane.xlu0 %3317 }
0x1229   :  { %4646 = vpow2.f32 %v3327_v59  ;;  %v3322_v60 = vsub.f32 %v4129_v61, %v3318_v58 }
0x122b   :  { %v3329_v62 = vmul.f32 1.442695, %v3322_v60 }
0x122d   :  { %4648 = vpow2.f32 %v3329_v62 }
0x1233   :  { %v4647_v63 = vpop.eup %4646 }
0x1234   :  { %v3337_v44 = vsel %vm384_vm3, %v4647_v63, 0.0 }
0x1235   :  { %3338 = vadd.xlane.f32.xlu1 %v3337_v44 }
0x1237   :  { %v5246_v0 = vpop.eup %4648 }
0x1238   :  { %v3340_v1 = vsel %vm384_vm3, %v5246_v0, 0.0 }
0x1239   :  { %3341 = vadd.xlane.f32.xlu0 %v3340_v1 }
0x1246   :  { %4521 = vrot.lane.b32.xlu1 %v4864_v47, %s4772_s20 }
0x124a   :  { %1003 = vrot.lane.b32.xlu1 %v5040_v19, %s4757_s17 }
0x124e   :  { %1005 = vrot.lane.b32.xlu1 %v5038_v18, %s4757_s17 }
0x124f   :  { %4526 = vrot.lane.b32.xlu0 %v4877_v57, %s4772_s20 }
0x1252   :  { %1426 = vrot.lane.b32.xlu1 %v5042_v20, %s4754_s29 }
0x1253   :  { %1424 = vrot.lane.b32.xlu0 %v5044_v21, %s4754_s29 }
0x1256   :  { %1847 = vrot.lane.b32.xlu1 %v5090_v38, %s4769_s16 }
0x1257   :  { %1845 = vrot.lane.b32.xlu0 %v5092_v39, %s4769_s16 }
0x125a   :  { %1007 = vrot.lane.b32.xlu1 %v4978_v56, %s4757_s17 }
0x125b   :  { %2266 = vrot.lane.b32.xlu0 %v5140_v6, %s4767_s14 }
0x125e   :  { %2687 = vrot.lane.b32.xlu1 %v5188_v41, %s4765_s12 }
0x125f   :  { %2268 = vrot.lane.b32.xlu0 %v5138_v5, %s4767_s14 }
0x1262   :  { %1428 = vrot.lane.b32.xlu1 %v5048_v25, %s4754_s29 }
0x1263   :  { %1009 = vrot.lane.b32.xlu0 %v4976_v53, %s4757_s17 }
0x1266   :  { %3108 = vrot.lane.b32.xlu1 %v3008_v13, %s4763_s10 }
0x1267   :  { %2689 = vrot.lane.b32.xlu0 %v5186_v37, %s4765_s12 }
0x126a   :  { %1849 = vrot.lane.b32.xlu1 %v5104_v48, %s4769_s16 }
0x126b   :  { %1430 = vrot.lane.b32.xlu0 %v5046_v23, %s4754_s29 }
0x126e   :  { %2270 = vrot.lane.b32.xlu1 %v5146_v12, %s4767_s14 }
0x126f   :  { %3110 = vrot.lane.b32.xlu0 %v4108_v10, %s4763_s10 }
0x1272   :  { %2272 = vrot.lane.b32.xlu1 %v5144_v11, %s4767_s14 }
0x1273   :  { %1851 = vrot.lane.b32.xlu0 %v5102_v46, %s4769_s16 }
0x1276   :  { %2693 = vrot.lane.b32.xlu1 %v5198_v51, %s4765_s12 }
0x1277   :  { %2691 = vrot.lane.b32.xlu0 %v5200_v54, %s4765_s12 }
0x127b   :  { %3112 = vrot.lane.b32.xlu0 %v3095_v24, %s4763_s10 }
0x12b1   :  { %v3336_v53 = vpop.xlane.xlu0 %3335 }
0x12b2   :  { %v3333_v47 = vpop.xlane.xlu1 %3332 }
0x12b3   :  { %4650 = vrcp.f32 %v3333_v47 }
0x12b4   :  { %4652 = vrcp.f32 %v3336_v53 }
0x12bd   :  { %v4651_v57 = vpop.eup %4650 }
0x12be   :  { %v3347_v56 = vmul.f32 %v4651_v57, %v4645_v42  ;;  %v4653_v38 = vpop.eup %4652  ;;  %v87_v42 = vld [vmem:[#allocation8 + $0x28] sm:$0xff] }
0x12bf   :  { %v3348_v11 = vmul.f32 %v4653_v38, %v5240_v35  ;;  %v86_v35 = vld [vmem:[#allocation8 + $0x20] sm:$0xff] }
0x12c0   :  { %4134 = vmatprep.mubr.msk.f32.mxu0 %vm384_vm3, %v3347_v56  ;;  %v4350_v43 = vpack.c.bf16 %v87_v42, %v86_v35 }
0x12c2   :  { %v3339_v18 = vpop.xlane.xlu1 %3338 }
0x12c3   :  { %4654 = vrcp.f32 %v3339_v18  ;;  %v3775_v18 = vld [vmem:[%s5363_s4] ss:$0 sm:$0xff]  ;;  %s4724_s4 = scalar_lea.vmem %s3663_s23, 512 }
0x12c4   :  { %p4725_p10 = scmp.ne.s32.totalorder %s3663_s23, %s4724_s4  ;;  %p4730_p12 = scmp.lt.s32.totalorder %s4724_s4, %s4724_s4 }
0x12c6   :  { %v4522_v19 = vpop.permute.xlu1 %4521  ;;  %v3342_v20 = vpop.xlane.xlu0 %3341  ;;  %p4731_p13 = por %p4730_p12, %p4729_p11 }
0x12c7   :  { %v4524_v21 = vunpack.i.h.bf16 %v4522_v19  ;;  %v4523_v23 = vunpack.i.l.bf16 %v4522_v19  ;;  %4656 = vrcp.f32 %v3342_v20 }
0x12c8   :  { %p4732_p0 = pnand %p4731_p13, %p4725_p10 }
0x12c9   :  { %v4334_v25 = vpack.c.bf16 %v4524_v21, %v4523_v23 }
0x12ca   :  { %v1004_v39 = vpop.permute.xlu1 %1003  ;;  %v4527_v46 = vpop.permute.xlu0 %4526 }
0x12cb   :  { %1016 = vst.msk [vmem:[#allocation2] sm:$0xff] %vm1015_vm4, %v1004_v39  ;;  %v4529_v48 = vunpack.i.h.bf16 %v4527_v46  ;;  %v4528_v5 = vunpack.i.l.bf16 %v4527_v46  ;;  %4335 = vmatprep.subr.bf16.mxu0 %v4334_v25 }
0x12cc   :  { %4337 = vmatpush3.bf16.msra.mxu0 %v4334_v25 }
0x12cd   :  { %v4655_v6 = vpop.eup %4654  ;;  %v4338_v12 = vpack.c.bf16 %v4529_v48, %v4528_v5  ;;  %4343 = vmatprep.subr.bf16.mxu0 %v4342_v32 }
0x12ce   :  { %v1006_v37 = vpop.permute.xlu1 %1005  ;;  %v1425_v41 = vpop.permute.xlu0 %1424  ;;  %v3349_v51 = vmul.f32 %v4655_v6, %v4647_v63 }
0x12cf   :  { %1017 = vst.msk [vmem:[#allocation2 + $0x8] sm:$0xff] %vm1015_vm4, %v1006_v37  ;;  %4135 = vmatmul.mubr.msk.f32.vlgmr.msra.gmra.mrb[32].mxu0 %vm384_vm3, %v3348_v11  ;;  %4339 = vmatprep.subr.bf16.mxu1 %v4338_v12 }
0x12d0   :  { %1437 = vst.msk [vmem:[#allocation2] sm:$0xff] %vm1436_vm5, %v1425_v41  ;;  %4341 = vmatpush3.bf16.msra.mxu1 %v4338_v12  ;;  %4141 = vmatprep.mubr.msk.f32.mxu1 %vm384_vm3, %v3349_v51 }
0x12d1   :  { %v4657_v54 = vpop.eup %4656  ;;  %4345 = vmatpush3.bf16.msra.mxu0 %v4342_v32 }
0x12d2   :  { %v3350_v52 = vmul.f32 %v4657_v54, %v5246_v0  ;;  %v1427_v36 = vpop.permute.xlu1 %1426  ;;  %v1846_v55 = vpop.permute.xlu0 %1845  ;;  %4347 = vmatprep.subr.bf16.mxu0 %v4346_v34 }
0x12d3   :  { %1438 = vst.msk [vmem:[#allocation2 + $0x8] sm:$0xff] %vm1436_vm5, %v1427_v36 }
0x12d4   :  { %1858 = vst.msk [vmem:[#allocation2] sm:$0xff] %vm1857_vm6, %v1846_v55  ;;  %4142 = vmatmul.mubr.msk.f32.vlgmr.msra.gmra.mrb[36].mxu1 %vm384_vm3, %v3350_v52 }
0x12d5   :  { %4349 = vmatpush3.bf16.msra.mxu0 %v4346_v34 }
0x12d6   :  { %v1848_v49 = vpop.permute.xlu1 %1847  ;;  %v2267_v2 = vpop.permute.xlu0 %2266  ;;  %4351 = vmatprep.subr.bf16.mxu0 %v4350_v43 }
0x12d7   :  { %1859 = vst.msk [vmem:[#allocation2 + $0x8] sm:$0xff] %vm1857_vm6, %v1848_v49 }
0x12d8   :  { %2279 = vst.msk [vmem:[#allocation2] sm:$0xff] %vm2278_vm7, %v2267_v2 }
0x12d9   :  { %4353 = vmatpush3.bf16.msra.mxu0 %v4350_v43 }
0x12da   :  { %v1008_v3 = vpop.permute.xlu1 %1007  ;;  %v2269_v4 = vpop.permute.xlu0 %2268  ;;  %4355 = vmatprep.subr.bf16.mxu0 %v4354_v50 }
0x12db   :  { %1018 = vst.msk [vmem:[#allocation2 + $0x10] sm:$0xff] %vm1015_vm4, %v1008_v3 }
0x12dc   :  { %2280 = vst.msk [vmem:[#allocation2 + $0x8] sm:$0xff] %vm2278_vm7, %v2269_v4 }
0x12dd   :  { %4357 = vmatpush3.bf16.msra.mxu0 %v4354_v50 }
0x12de   :  { %v2688_v7 = vpop.permute.xlu1 %2687  ;;  %v1010_v8 = vpop.permute.xlu0 %1009 }
0x12df   :  { %2700 = vst.msk [vmem:[#allocation2] sm:$0xff] %vm2699_vm8, %v2688_v7 }
0x12e0   :  { %1019 = vst.msk [vmem:[#allocation2 + $0x18] sm:$0xff] %vm1015_vm4, %v1010_v8 }
0x12e2   :  { %v1429_v9 = vpop.permute.xlu1 %1428  ;;  %v2690_v10 = vpop.permute.xlu0 %2689 }
0x12e3   :  { %1439 = vst.msk [vmem:[#allocation2 + $0x10] sm:$0xff] %vm1436_vm5, %v1429_v9 }
0x12e4   :  { %2701 = vst.msk [vmem:[#allocation2 + $0x8] sm:$0xff] %vm2699_vm8, %v2690_v10 }
0x12e6   :  { %v3109_v13 = vpop.permute.xlu1 %3108  ;;  %v1431_v15 = vpop.permute.xlu0 %1430 }
0x12e7   :  { %3121 = vst.msk [vmem:[#allocation2] sm:$0xff] %vm3120_vm9, %v3109_v13 }
0x12e8   :  { %1440 = vst.msk [vmem:[#allocation2 + $0x18] sm:$0xff] %vm1436_vm5, %v1431_v15 }
0x12ea   :  { %v1850_v16 = vpop.permute.xlu1 %1849  ;;  %v3111_v14 = vpop.permute.xlu0 %3110 }
0x12eb   :  { %1860 = vst.msk [vmem:[#allocation2 + $0x10] sm:$0xff] %vm1857_vm6, %v1850_v16 }
0x12ec   :  { %3122 = vst.msk [vmem:[#allocation2 + $0x8] sm:$0xff] %vm3120_vm9, %v3111_v14 }
0x12ee   :  { %v2271_v17 = vpop.permute.xlu1 %2270  ;;  %v1852_v24 = vpop.permute.xlu0 %1851 }
0x12ef   :  { %2281 = vst.msk [vmem:[#allocation2 + $0x10] sm:$0xff] %vm2278_vm7, %v2271_v17 }
0x12f0   :  { %1861 = vst.msk [vmem:[#allocation2 + $0x18] sm:$0xff] %vm1857_vm6, %v1852_v24 }
0x12f2   :  { %v2273_v61 = vpop.permute.xlu1 %2272  ;;  %v2692_v26 = vpop.permute.xlu0 %2691 }
0x12f3   :  { %2282 = vst.msk [vmem:[#allocation2 + $0x18] sm:$0xff] %vm2278_vm7, %v2273_v61 }
0x12f4   :  { %2702 = vst.msk [vmem:[#allocation2 + $0x10] sm:$0xff] %vm2699_vm8, %v2692_v26 }
0x12f6   :  { %v2694_v27 = vpop.permute.xlu1 %2693  ;;  %v3113_v28 = vpop.permute.xlu0 %3112 }
0x12f7   :  { %2703 = vst.msk [vmem:[#allocation2 + $0x18] sm:$0xff] %vm2699_vm8, %v2694_v27 }
0x12f8   :  { %3123 = vst.msk [vmem:[#allocation2 + $0x10] sm:$0xff] %vm3120_vm9, %v3113_v28 }
0x13a2   :  { %v4136_v59 = vpop.f32.mrb[32].mxu0 }
0x13a3   :  { %3531 = vrot.lane.b32.xlu0 %v4136_v59, %s4761_s8  ;;  %v3429_v58 = vpop.f32.mrb[33].mxu0 }
0x13a4   :  { %3529 = vrot.lane.b32.xlu1 %v3429_v58, %s4761_s8 }
0x13a7   :  { %v4143_v60 = vpop.f32.mrb[36].mxu1 }
0x13a8   :  { %3114 = vrot.lane.b32.xlu1 %v5236_v22, %s4763_s10  ;;  %v3516_v62 = vpop.f32.mrb[37].mxu1 }
0x13a9   :  { %3533 = vrot.lane.b32.xlu0 %v3516_v62, %s4761_s8 }
0x13ac   :  { %3535 = vrot.lane.b32.xlu1 %v4143_v60, %s4761_s8 }
0x1415   :  { %v3532_v63 = vpop.permute.xlu0 %3531 }
0x1416   :  { %3543 = vst.msk [vmem:[#allocation2 + $0x8] sm:$0xff] %vm3541_vm10, %v3532_v63  ;;  %v3530_v44 = vpop.permute.xlu1 %3529 }
0x1417   :  { %3542 = vst.msk [vmem:[#allocation2] sm:$0xff] %vm3541_vm10, %v3530_v44 }
0x141a   :  { %v3115_v0 = vpop.permute.xlu1 %3114 }
0x141b   :  { %3124 = vst.msk [vmem:[#allocation2 + $0x18] sm:$0xff] %vm3120_vm9, %v3115_v0  ;;  %v3534_v1 = vpop.permute.xlu0 %3533 }
0x141c   :  { %3544 = vst.msk [vmem:[#allocation2 + $0x10] sm:$0xff] %vm3541_vm10, %v3534_v1 }
0x141d   :  { %v3547_v22 = vld [vmem:[#allocation2 + $0x8] sm:$0xff] }
0x141e   :  { %v3536_v47 = vpop.permute.xlu1 %3535  ;;  %v3546_v57 = vld [vmem:[#allocation2] sm:$0xff] }
0x141f   :  { %3545 = vst.msk [vmem:[#allocation2 + $0x18] sm:$0xff] %vm3541_vm10, %v3536_v47  ;;  %4160 = vmatprep.mubr.msk.f32.mxu0 %vm103_vm0, %v3546_v57 }
0x1420   :  { %4161 = vmatmul.mubr.msk.f32.vlgmr.msra.gmra.mrb[34].mxu0 %vm103_vm0, %v3547_v22 }
0x1423   :  { %v3548_v53 = vld [vmem:[#allocation2 + $0x10] sm:$0xff] }
0x1424   :  { %4163 = vmatprep.mubr.msk.f32.mxu0 %vm103_vm0, %v3548_v53 }
0x1426   :  { %v3549_v56 = vld [vmem:[#allocation2 + $0x18] sm:$0xff] }
0x1427   :  { %4164 = vmatmul.mubr.msk.f32.gmra.mrb[36].mxu0 %vm103_vm0, %v3549_v56 }
0x14f3   :  { %v4162_v19 = vpop.f32.mrb[34].mxu0 }
0x14f4   :  { %v3640_v20 = vadd.f32 %v4162_v19, %v3775_v18  ;;  %v3634_v21 = vpop.f32.mrb[35].mxu0 }
0x14f5   :  { %v3635_v23 = vadd.f32 %v3775_v18, %v3634_v21 }
0x14f6   :  { %3654 = vst.msk [vmem:[#allocation9 + $0x8] sm:$0xff] %vm103_vm0, %v3640_v20 }
0x14f7   :  { %3653 = vst.msk [vmem:[#allocation9] sm:$0xff] %vm103_vm0, %v3635_v23 }
0x14fa   :  { %v4165_v25 = vpop.f32.mrb[36].mxu0 }
0x14fb   :  { %v3650_v38 = vadd.f32 %v4165_v25, %v3775_v18  ;;  %v3644_v39 = vpop.f32.mrb[37].mxu0 }
0x14fc   :  { %v3645_v46 = vadd.f32 %v3775_v18, %v3644_v39 }
0x14fd   :  { %3656 = vst.msk [vmem:[#allocation9 + $0x18] sm:$0xff] %vm103_vm0, %v3650_v38 }
0x14fe   :  { %3655 = vst.msk [vmem:[#allocation9 + $0x10] sm:$0xff] %vm103_vm0, %v3645_v46 }
0x14ff   :  { %4735 = shalt.err (!%p4732_p0)
}
0x1500   :  { %s4736_s26 = scalar_lea.hbm %s5364_s5, 512 }
0x1501   :  { %p4737_p1 = scmp.ne.s32.totalorder %s5364_s5, %s4736_s26  ;;  %p4740_p2 = scmp.lt.u32.totalorder %s4736_s26, %s5364_s5 }
0x1503   :  { %p4742_p3 = pnand %p4740_p2, %p4737_p1 }
0x1505   :  { %4745 = shalt.err (!%p4742_p3)
}
0x1506   :  { %3668 = dma.vmem_to_hbm [thread:$0]  %s3663_s23, 512, %s5364_s5, [#allocation5], %s4756_s1, %s4756_s1, %s4757_s17  }
0x1507   :  { %4750 = dma.done.wait [#allocation5], 512  }
0x1508   :  { %4751 = vsyncadd [#allocation5], 4294966784 }
0x1509   :  { %3672 = vsyncpa [#allocation4], 1 }
0x150a   :  { %3673 = vsyncpa [#allocation7], 1 }
0x150b   :  { %3674 = vsyncpa [#allocation5], 1 }

</bundles_post_ra>
